<compile_context>
chip_gen: v5e
topology: v5e:2x2
jax: 0.10.0
libtpu: 0.0.40
codegen_flags: <defaults>
</compile_context>

<pallas_src>
import jax
import jax.numpy as jnp
from jax.experimental import pallas as pl
from jax.experimental.pallas import tpu as pltpu

EMB_DIM = 32
NUM_CONTEXT = 2 + 24 + 7     # 33, as in the PyTorch module
HIDDEN = 64
NUM_CLASSES = 5
VOCAB_SIZE = 100

LANE = 128
CTX_PAD = LANE               # 33  -> 128 (zero padded)
OUT_PAD = LANE               # 5   -> 128 (zero padded)


def _round_up(x, m):
    return (x + m - 1) // m * m


def baseline_kernel(ids_ref, ctx_ref, w1a_ref, w1b_ref, b1_ref, w2_ref, b2_ref,
                    out_ref):
    # ids_ref : (TB, seq)       int32  token ids (batch-major)
    # ctx_ref : (TB, 128)       bf16   context features (zero cols past 33)
    # w1a_ref : (V_pad, 64)     bf16   (emb_table @ W1[:emb]) / seq, zero rows past V
    # w1b_ref : (128, 64)       bf16   W1[emb:], zero rows past 33
    # b1_ref  : (1, 64)         f32
    # w2_ref  : (64, 128)       bf16   W2, zero cols past 5
    # b2_ref  : (1, 128)        f32    zero cols past 5
    # out_ref : (TB, 128)       f32
    tb, seq = ids_ref.shape
    v_pad = w1a_ref.shape[0]

    # counts[b, v] = #(ids[b, :] == v).  Replaces gather + mean(0); padded
    # vocab columns stay zero because ids < VOCAB_SIZE.
    v_iota = jax.lax.broadcasted_iota(jnp.int32, (tb, v_pad), 1)
    counts = jnp.zeros((tb, v_pad), jnp.float32)
    for t in range(seq):                         # static unroll; seq is small
        ids_col = ids_ref[:, t:t + 1]            # (TB, 1) int32, lane-broadcast
        counts = counts + (ids_col == v_iota).astype(jnp.float32)

    # fc1 on the (virtual) concat [mean(embedded), context]:
    #   mean(emb) @ W1a + ctx @ W1b + b1     (bf16 MXU, f32 accumulate)
    h = jnp.dot(counts.astype(jnp.bfloat16), w1a_ref[...],
                preferred_element_type=jnp.float32)
    h = h + jnp.dot(ctx_ref[...], w1b_ref[...],
                    preferred_element_type=jnp.float32)
    h = h + b1_ref[...]

    # sigmoid: exp on the EUP, approximate reciprocal also on the EUP.
    h = pl.reciprocal(1.0 + jnp.exp(-h), approx=True)

    out = jnp.dot(h.astype(jnp.bfloat16), w2_ref[...],
                  preferred_element_type=jnp.float32)
    out_ref[...] = (out + b2_ref[...]).astype(out_ref.dtype)


def baseline_forward(title, context, params):
    """title: (seq, batch) int ids; context: (batch, 33) f32 -> (batch, 5) f32."""
    emb, w1, b1, w2, b2 = (params["emb"], params["w1"], params["b1"],
                           params["w2"], params["b2"])
    seq, batch = title.shape
    vocab, emb_dim = emb.shape

    # Fold the embedding lookup + seq-mean into fc1's embedding half:
    #   average @ W1a == counts @ ((E @ W1a) / seq)
    w1a_eff = (emb @ w1[:emb_dim, :]) / seq                       # (V, 64) f32
    w1b = w1[emb_dim:, :]                                         # (33, 64)

    v_pad = _round_up(vocab, LANE)
    w1a_p = jnp.pad(w1a_eff, ((0, v_pad - vocab), (0, 0))).astype(jnp.bfloat16)
    w1b_p = jnp.pad(w1b, ((0, CTX_PAD - w1b.shape[0]), (0, 0))).astype(jnp.bfloat16)
    b1_2d = b1.reshape(1, HIDDEN).astype(jnp.float32)
    w2_p = jnp.pad(w2, ((0, 0), (0, OUT_PAD - w2.shape[1]))).astype(jnp.bfloat16)
    b2_2d = jnp.pad(b2.reshape(1, -1),
                    ((0, 0), (0, OUT_PAD - b2.shape[-1]))).astype(jnp.float32)

    # Batch tiling: pad batch to a multiple of the tile; pad rows use id 0 and
    # zero context and are sliced off below.
    tb = min(512, _round_up(max(batch, 1), LANE))
    batch_p = _round_up(batch, tb)
    title_bt = jnp.pad(title.T.astype(jnp.int32), ((0, batch_p - batch), (0, 0)))
    ctx_p = jnp.pad(context.astype(jnp.float32),
                    ((0, batch_p - batch), (0, CTX_PAD - context.shape[1]))
                    ).astype(jnp.bfloat16)

    grid = (batch_p // tb,)
    out = pl.pallas_call(
        baseline_kernel,
        out_shape=jax.ShapeDtypeStruct((batch_p, OUT_PAD), jnp.float32),
        grid=grid,
        in_specs=[
            pl.BlockSpec((tb, seq), lambda i: (i, 0)),          # token ids
            pl.BlockSpec((tb, CTX_PAD), lambda i: (i, 0)),      # context
            pl.BlockSpec((v_pad, HIDDEN), lambda i: (0, 0)),    # folded W1a
            pl.BlockSpec((CTX_PAD, HIDDEN), lambda i: (0, 0)),  # W1b
            pl.BlockSpec((1, HIDDEN), lambda i: (0, 0)),        # b1
            pl.BlockSpec((HIDDEN, OUT_PAD), lambda i: (0, 0)),  # W2
            pl.BlockSpec((1, OUT_PAD), lambda i: (0, 0)),       # b2
        ],
        out_specs=pl.BlockSpec((tb, OUT_PAD), lambda i: (i, 0)),
        compiler_params=pltpu.CompilerParams(
            dimension_semantics=("parallel",)),
    )(title_bt, ctx_p, w1a_p, w1b_p, b1_2d, w2_p, b2_2d)

    return out[:batch, :NUM_CLASSES]


def init_params(key):
    k_emb, k_w1, k_b1, k_w2, k_b2 = jax.random.split(key, 5)
    in_dim = EMB_DIM + NUM_CONTEXT
    return {
        # Embedding.from_pretrained(vocab.vectors): deterministic synthetic table.
        "emb": jax.random.normal(k_emb, (VOCAB_SIZE, EMB_DIM), jnp.float32) * 0.1,
        # Store fc weights as (in, out) so the math is x @ W (== x @ W_torch.T).
        "w1": jax.random.normal(k_w1, (in_dim, HIDDEN), jnp.float32) * 0.05,
        "b1": jax.random.normal(k_b1, (HIDDEN,), jnp.float32) * 0.05,
        "w2": jax.random.normal(k_w2, (HIDDEN, NUM_CLASSES), jnp.float32) * 0.05,
        "b2": jax.random.normal(k_b2, (NUM_CLASSES,), jnp.float32) * 0.05,
    }


if __name__ == "__main__":
    key = jax.random.PRNGKey(0)
    k_params, k_title, k_ctx = jax.random.split(key, 3)

    params = init_params(k_params)

    seq, batch = 8, 2
    title = jax.random.randint(k_title, (seq, batch), 0, VOCAB_SIZE, dtype=jnp.int32)
    context = jax.random.normal(k_ctx, (batch, NUM_CONTEXT), jnp.float32)

    out = jax.jit(baseline_forward)(title, context, params)
    out = jax.block_until_ready(out)

    # Pure-JAX f32 reference of the same math.
    embedded = params["emb"][title]
    average = embedded.mean(0)
    withctx = jnp.concatenate([average, context], axis=1)
    h = jax.nn.sigmoid(withctx @ params["w1"] + params["b1"])
    ref = h @ params["w2"] + params["b2"]

    assert out.shape == (batch, NUM_CLASSES)
    # bf16 matmuls + approx reciprocal in the kernel -> loosened tolerance.
    assert jnp.allclose(out, ref, atol=3e-2, rtol=3e-2), (
        "mismatch vs reference: max|diff|=%f" % float(jnp.max(jnp.abs(out - ref))))

    print("KERNEL_OK")
</pallas_src>

<mosaic_0001>
module attributes {stable_mosaic.version = 11 : i64} {
  func.func @baseline_kernel(%arg0: i32, %arg1: memref<128x8xi32, #tpu.memory_space<vmem>>, %arg2: memref<128x128xbf16, #tpu.memory_space<vmem>>, %arg3: memref<128x64xbf16, #tpu.memory_space<vmem>>, %arg4: memref<128x64xbf16, #tpu.memory_space<vmem>>, %arg5: memref<1x64xf32, #tpu.memory_space<vmem>>, %arg6: memref<64x128xbf16, #tpu.memory_space<vmem>>, %arg7: memref<1x128xf32, #tpu.memory_space<vmem>>, %arg8: memref<128x128xf32, #tpu.memory_space<vmem>>) attributes {dimension_semantics = [#tpu.dimension_semantics<parallel>], iteration_bounds = array<i64: 1>, scalar_prefetch = 0 : i64, scratch_operands = 0 : i64, tpu.core_type = #tpu.core_type<tc>, window_params = [{transform_indices = @transform_0, window_bounds = array<i64: 128, 8>}, {transform_indices = @transform_1, window_bounds = array<i64: 128, 128>}, {pipeline_mode = #tpu.pipeline_mode<synchronous>, transform_indices = @transform_2, window_bounds = array<i64: 128, 64>}, {pipeline_mode = #tpu.pipeline_mode<synchronous>, transform_indices = @transform_3, window_bounds = array<i64: 128, 64>}, {pipeline_mode = #tpu.pipeline_mode<synchronous>, transform_indices = @transform_4, window_bounds = array<i64: 1, 64>}, {pipeline_mode = #tpu.pipeline_mode<synchronous>, transform_indices = @transform_5, window_bounds = array<i64: 64, 128>}, {pipeline_mode = #tpu.pipeline_mode<synchronous>, transform_indices = @transform_6, window_bounds = array<i64: 1, 128>}, {transform_indices = @transform_7, window_bounds = array<i64: 128, 128>}]} {
    %0 = tpu.iota {dimensions = array<i32: 1>} : vector<128x128xi32>
    %cst = arith.constant 0.000000e+00 : f32
    %1 = vector.broadcast %cst : f32 to vector<128x128xf32>
    %c0 = arith.constant 0 : index
    %c0_0 = arith.constant 0 : index
    %2 = vector.load %arg1[%c0, %c0_0] : memref<128x8xi32, #tpu.memory_space<vmem>>, vector<128x1xi32>
    %3 = vector.broadcast %2 : vector<128x1xi32> to vector<128x128xi32>
    %4 = arith.cmpi eq, %3, %0 : vector<128x128xi32>
    %5 = arith.extui %4 : vector<128x128xi1> to vector<128x128xi32>
    %6 = arith.sitofp %5 : vector<128x128xi32> to vector<128x128xf32>
    %7 = arith.addf %1, %6 : vector<128x128xf32>
    %c0_1 = arith.constant 0 : index
    %c1 = arith.constant 1 : index
    %8 = vector.load %arg1[%c0_1, %c1] : memref<128x8xi32, #tpu.memory_space<vmem>>, vector<128x1xi32>
    %9 = vector.broadcast %8 : vector<128x1xi32> to vector<128x128xi32>
    %10 = arith.cmpi eq, %9, %0 : vector<128x128xi32>
    %11 = arith.extui %10 : vector<128x128xi1> to vector<128x128xi32>
    %12 = arith.sitofp %11 : vector<128x128xi32> to vector<128x128xf32>
    %13 = arith.addf %7, %12 : vector<128x128xf32>
    %c0_2 = arith.constant 0 : index
    %c2 = arith.constant 2 : index
    %14 = vector.load %arg1[%c0_2, %c2] : memref<128x8xi32, #tpu.memory_space<vmem>>, vector<128x1xi32>
    %15 = vector.broadcast %14 : vector<128x1xi32> to vector<128x128xi32>
    %16 = arith.cmpi eq, %15, %0 : vector<128x128xi32>
    %17 = arith.extui %16 : vector<128x128xi1> to vector<128x128xi32>
    %18 = arith.sitofp %17 : vector<128x128xi32> to vector<128x128xf32>
    %19 = arith.addf %13, %18 : vector<128x128xf32>
    %c0_3 = arith.constant 0 : index
    %c3 = arith.constant 3 : index
    %20 = vector.load %arg1[%c0_3, %c3] : memref<128x8xi32, #tpu.memory_space<vmem>>, vector<128x1xi32>
    %21 = vector.broadcast %20 : vector<128x1xi32> to vector<128x128xi32>
    %22 = arith.cmpi eq, %21, %0 : vector<128x128xi32>
    %23 = arith.extui %22 : vector<128x128xi1> to vector<128x128xi32>
    %24 = arith.sitofp %23 : vector<128x128xi32> to vector<128x128xf32>
    %25 = arith.addf %19, %24 : vector<128x128xf32>
    %c0_4 = arith.constant 0 : index
    %c4 = arith.constant 4 : index
    %26 = vector.load %arg1[%c0_4, %c4] : memref<128x8xi32, #tpu.memory_space<vmem>>, vector<128x1xi32>
    %27 = vector.broadcast %26 : vector<128x1xi32> to vector<128x128xi32>
    %28 = arith.cmpi eq, %27, %0 : vector<128x128xi32>
    %29 = arith.extui %28 : vector<128x128xi1> to vector<128x128xi32>
    %30 = arith.sitofp %29 : vector<128x128xi32> to vector<128x128xf32>
    %31 = arith.addf %25, %30 : vector<128x128xf32>
    %c0_5 = arith.constant 0 : index
    %c5 = arith.constant 5 : index
    %32 = vector.load %arg1[%c0_5, %c5] : memref<128x8xi32, #tpu.memory_space<vmem>>, vector<128x1xi32>
    %33 = vector.broadcast %32 : vector<128x1xi32> to vector<128x128xi32>
    %34 = arith.cmpi eq, %33, %0 : vector<128x128xi32>
    %35 = arith.extui %34 : vector<128x128xi1> to vector<128x128xi32>
    %36 = arith.sitofp %35 : vector<128x128xi32> to vector<128x128xf32>
    %37 = arith.addf %31, %36 : vector<128x128xf32>
    %c0_6 = arith.constant 0 : index
    %c6 = arith.constant 6 : index
    %38 = vector.load %arg1[%c0_6, %c6] : memref<128x8xi32, #tpu.memory_space<vmem>>, vector<128x1xi32>
    %39 = vector.broadcast %38 : vector<128x1xi32> to vector<128x128xi32>
    %40 = arith.cmpi eq, %39, %0 : vector<128x128xi32>
    %41 = arith.extui %40 : vector<128x128xi1> to vector<128x128xi32>
    %42 = arith.sitofp %41 : vector<128x128xi32> to vector<128x128xf32>
    %43 = arith.addf %37, %42 : vector<128x128xf32>
    %c0_7 = arith.constant 0 : index
    %c7 = arith.constant 7 : index
    %44 = vector.load %arg1[%c0_7, %c7] : memref<128x8xi32, #tpu.memory_space<vmem>>, vector<128x1xi32>
    %45 = vector.broadcast %44 : vector<128x1xi32> to vector<128x128xi32>
    %46 = arith.cmpi eq, %45, %0 : vector<128x128xi32>
    %47 = arith.extui %46 : vector<128x128xi1> to vector<128x128xi32>
    %48 = arith.sitofp %47 : vector<128x128xi32> to vector<128x128xf32>
    %49 = arith.addf %43, %48 : vector<128x128xf32>
    %50 = arith.truncf %49 : vector<128x128xf32> to vector<128x128xbf16>
    %c0_8 = arith.constant 0 : index
    %c0_9 = arith.constant 0 : index
    %51 = vector.load %arg3[%c0_8, %c0_9] : memref<128x64xbf16, #tpu.memory_space<vmem>>, vector<128x64xbf16>
    %cst_10 = arith.constant dense<0.000000e+00> : vector<128x64xf32>
    %52 = tpu.matmul %50, %51, %cst_10 {dimension_numbers = #tpu.dot_dimension_numbers<[1], [0], [0], [1], [0, 0, 1, 1], [], []>} : vector<128x128xbf16>, vector<128x64xbf16>, vector<128x64xf32> -> vector<128x64xf32>
    %c0_11 = arith.constant 0 : index
    %c0_12 = arith.constant 0 : index
    %53 = vector.load %arg2[%c0_11, %c0_12] : memref<128x128xbf16, #tpu.memory_space<vmem>>, vector<128x128xbf16>
    %c0_13 = arith.constant 0 : index
    %c0_14 = arith.constant 0 : index
    %54 = vector.load %arg4[%c0_13, %c0_14] : memref<128x64xbf16, #tpu.memory_space<vmem>>, vector<128x64xbf16>
    %cst_15 = arith.constant dense<0.000000e+00> : vector<128x64xf32>
    %55 = tpu.matmul %53, %54, %cst_15 {dimension_numbers = #tpu.dot_dimension_numbers<[1], [0], [0], [1], [0, 0, 1, 1], [], []>} : vector<128x128xbf16>, vector<128x64xbf16>, vector<128x64xf32> -> vector<128x64xf32>
    %56 = arith.addf %52, %55 : vector<128x64xf32>
    %c0_16 = arith.constant 0 : index
    %c0_17 = arith.constant 0 : index
    %57 = vector.load %arg5[%c0_16, %c0_17] : memref<1x64xf32, #tpu.memory_space<vmem>>, vector<1x64xf32>
    %58 = vector.broadcast %57 : vector<1x64xf32> to vector<128x64xf32>
    %59 = arith.addf %56, %58 : vector<128x64xf32>
    %cst_18 = arith.constant 0.000000e+00 : f32
    %60 = vector.broadcast %cst_18 : f32 to vector<128x64xf32>
    %61 = arith.subf %60, %59 : vector<128x64xf32>
    %62 = math.exp %61 : vector<128x64xf32>
    %cst_19 = arith.constant 1.000000e+00 : f32
    %63 = vector.broadcast %cst_19 : f32 to vector<128x64xf32>
    %64 = arith.addf %63, %62 : vector<128x64xf32>
    %65 = tpu.reciprocal %64 {approx = true} : vector<128x64xf32> -> vector<128x64xf32>
    %66 = arith.truncf %65 : vector<128x64xf32> to vector<128x64xbf16>
    %c0_20 = arith.constant 0 : index
    %c0_21 = arith.constant 0 : index
    %67 = vector.load %arg6[%c0_20, %c0_21] : memref<64x128xbf16, #tpu.memory_space<vmem>>, vector<64x128xbf16>
    %cst_22 = arith.constant dense<0.000000e+00> : vector<128x128xf32>
    %68 = tpu.matmul %66, %67, %cst_22 {dimension_numbers = #tpu.dot_dimension_numbers<[1], [0], [0], [1], [0, 0, 1, 1], [], []>} : vector<128x64xbf16>, vector<64x128xbf16>, vector<128x128xf32> -> vector<128x128xf32>
    %c0_23 = arith.constant 0 : index
    %c0_24 = arith.constant 0 : index
    %69 = vector.load %arg7[%c0_23, %c0_24] : memref<1x128xf32, #tpu.memory_space<vmem>>, vector<1x128xf32>
    %70 = vector.broadcast %69 : vector<1x128xf32> to vector<128x128xf32>
    %71 = arith.addf %68, %70 : vector<128x128xf32>
    %c0_25 = arith.constant 0 : index
    %c0_26 = arith.constant 0 : index
    %72 = vector.load %arg8[%c0_25, %c0_26] : memref<128x128xf32, #tpu.memory_space<vmem>>, vector<128x128xf32>
    tpu.vector_store %arg8[%c0_25, %c0_26], %71 {strides = array<i32>} : memref<128x128xf32, #tpu.memory_space<vmem>>, vector<128x128xf32>,
    return
  }
  func.func @transform_0(%arg0: i32) -> (i32, i32) {
    %c0_i32 = arith.constant 0 : i32
    %c0_i32_0 = arith.constant 0 : i32
    return %arg0, %c0_i32 : i32, i32
  }
  func.func @transform_1(%arg0: i32) -> (i32, i32) {
    %c0_i32 = arith.constant 0 : i32
    %c0_i32_0 = arith.constant 0 : i32
    return %arg0, %c0_i32 : i32, i32
  }
  func.func @transform_2(%arg0: i32) -> (i32, i32) {
    %c0_i32 = arith.constant 0 : i32
    %c0_i32_0 = arith.constant 0 : i32
    %c0_i32_1 = arith.constant 0 : i32
    return %c0_i32, %c0_i32_0 : i32, i32
  }
  func.func @transform_3(%arg0: i32) -> (i32, i32) {
    %c0_i32 = arith.constant 0 : i32
    %c0_i32_0 = arith.constant 0 : i32
    %c0_i32_1 = arith.constant 0 : i32
    return %c0_i32, %c0_i32_0 : i32, i32
  }
  func.func @transform_4(%arg0: i32) -> (i32, i32) {
    %c0_i32 = arith.constant 0 : i32
    %c0_i32_0 = arith.constant 0 : i32
    %c0_i32_1 = arith.constant 0 : i32
    return %c0_i32, %c0_i32_0 : i32, i32
  }
  func.func @transform_5(%arg0: i32) -> (i32, i32) {
    %c0_i32 = arith.constant 0 : i32
    %c0_i32_0 = arith.constant 0 : i32
    %c0_i32_1 = arith.constant 0 : i32
    return %c0_i32, %c0_i32_0 : i32, i32
  }
  func.func @transform_6(%arg0: i32) -> (i32, i32) {
    %c0_i32 = arith.constant 0 : i32
    %c0_i32_0 = arith.constant 0 : i32
    %c0_i32_1 = arith.constant 0 : i32
    return %c0_i32, %c0_i32_0 : i32, i32
  }
  func.func @transform_7(%arg0: i32) -> (i32, i32) {
    %c0_i32 = arith.constant 0 : i32
    %c0_i32_0 = arith.constant 0 : i32
    return %arg0, %c0_i32 : i32, i32
  }
}

</mosaic_0001>

<bundles_post_ra>
// kernel: baseline_forward.1
= control target key start
LH: loop header
LB: loop body
LE: loop exit
PB: predicated region body
PF: predicated region fallthrough
CT: control target
= control target key end

     0   :  { %v1932_v0 = vmov 0   ;;  %v1933_v17 = vmov 1   ;;  %v1934_v18 = vmov 2   ;;  %v27_v26 = vlaneseq  ;;  %s2901_s0 = inlined_call_operand.vmem [shape: s32[128,8], index: 0, kind: input, shape index: {}]   ;;  %s2902_s3 = inlined_call_operand.vmem [shape: bf16[128,64], index: 3, kind: input, shape index: {}]   ;;  %s2903_s2 = inlined_call_operand.vmem [shape: bf16[128,64], index: 2, kind: input, shape index: {}]   ;;  %s2904_s1 = inlined_call_operand.vmem [shape: bf16[128,128], index: 1, kind: input, shape index: {}]   ;;  %s2905_s4 = inlined_call_operand.vmem [shape: f32[1,64], index: 4, kind: input, shape index: {}]   ;;  %s2906_s5 = inlined_call_operand.vmem [shape: bf16[64,128], index: 5, kind: input, shape index: {}]   ;;  %s2907_s6 = inlined_call_operand.vmem [shape: f32[1,128], index: 6, kind: input, shape index: {}]   ;;  %s2908_s7 = inlined_call_operand.vmem [shape: f32[128,128], index: 7, kind: output, shape index: {}]  }
   0x1   :  { %1784 = vset.pattern.permute.xlu2 %v1932_v0  ;;  %1783 = vset.pattern.permute.xlu1 %v1932_v0  ;;  %v1984_v1 = vld [vmem:[%s2901_s0 + $0x20] sm:$0xff]  ;;  %v1989_v2 = vld [vmem:[%s2901_s0 + $0x10] sm:$0xff]  ;;  %v2002_v4 = vld [vmem:[%s2901_s0 + $0x28] sm:$0xff]  ;;  %v1935_v29 = vmov 4   ;;  %v1936_v32 = vmov 3   ;;  %v1937_v34 = vmov 0.0  }
   0x2   :  { %v1994_v3 = vld [vmem:[%s2901_s0] sm:$0xff]  ;;  %1782 = vset.pattern.permute.xlu0 %v1932_v0  ;;  %58 = vperm.xlu2 %1784, %v1984_v1   ;;  %v2007_v5 = vld [vmem:[%s2901_s0 + $0x18] sm:$0xff]  ;;  %v2012_v6 = vld [vmem:[%s2901_s0 + $0x8] sm:$0xff]  ;;  %v2122_v30 = vand.u32 127, %v27_v26  ;;  %v1938_v37 = vmov 6   ;;  %v1939_v45 = vmov 5  }
   0x3   :  { %52 = vperm.xlu1 %1783, %v1989_v2   ;;  %46 = vperm.xlu0 %1782, %v1994_v3   ;;  %v2020_v7 = vld [vmem:[%s2901_s0 + $0x40] sm:$0xff]  ;;  %v2025_v8 = vld [vmem:[%s2901_s0 + $0x38] sm:$0xff]  ;;  %v2030_v9 = vld [vmem:[%s2901_s0 + $0x30] sm:$0xff]  ;;  %v1940_v53 = vmov 7  }
   0x4   :  { %v2038_v10 = vld [vmem:[%s2901_s0 + $0x58] sm:$0xff]  ;;  %v2043_v11 = vld [vmem:[%s2901_s0 + $0x50] sm:$0xff]  ;;  %v2048_v12 = vld [vmem:[%s2901_s0 + $0x48] sm:$0xff] }
   0x5   :  { %v2056_v13 = vld [vmem:[%s2901_s0 + $0x70] sm:$0xff]  ;;  %v2061_v14 = vld [vmem:[%s2901_s0 + $0x68] sm:$0xff]  ;;  %v2066_v15 = vld [vmem:[%s2901_s0 + $0x60] sm:$0xff] }
   0x6   :  { %v2074_v16 = vld [vmem:[%s2901_s0 + $0x78] sm:$0xff] }
   0xa   :  { %61 = vperm.xlu2 %1784, %v2002_v4  }
   0xb   :  { %55 = vperm.xlu1 %1783, %v2007_v5   ;;  %49 = vperm.xlu0 %1782, %v2012_v6  }
  0x12   :  { %70 = vperm.xlu2 %1784, %v2020_v7  }
  0x13   :  { %67 = vperm.xlu1 %1783, %v2025_v8   ;;  %64 = vperm.xlu0 %1782, %v2030_v9  }
  0x1a   :  { %79 = vperm.xlu2 %1784, %v2038_v10  }
  0x1b   :  { %76 = vperm.xlu1 %1783, %v2043_v11   ;;  %73 = vperm.xlu0 %1782, %v2048_v12  }
  0x22   :  { %88 = vperm.xlu2 %1784, %v2056_v13  }
  0x23   :  { %85 = vperm.xlu1 %1783, %v2061_v14   ;;  %82 = vperm.xlu0 %1782, %v2066_v15  }
  0x2a   :  { %1786 = vset.pattern.permute.xlu2 %v1933_v17 }
  0x2b   :  { %1785 = vset.pattern.permute.xlu1 %v1933_v17  ;;  %91 = vperm.xlu0 %1782, %v2074_v16  }
  0x2c   :  { %161 = vperm.xlu2 %1786, %v2012_v6   ;;  %158 = vperm.xlu1 %1785, %v1994_v3  }
  0x33   :  { %1787 = vset.pattern.permute.xlu0 %v1933_v17 }
  0x34   :  { %170 = vperm.xlu2 %1786, %v1984_v1   ;;  %167 = vperm.xlu1 %1785, %v2007_v5  }
  0x35   :  { %164 = vperm.xlu0 %1787, %v1989_v2  }
  0x3c   :  { %176 = vperm.xlu2 %1786, %v2030_v9   ;;  %173 = vperm.xlu1 %1785, %v2002_v4  }
  0x3d   :  { %179 = vperm.xlu0 %1787, %v2025_v8  }
  0x44   :  { %185 = vperm.xlu2 %1786, %v2048_v12   ;;  %182 = vperm.xlu1 %1785, %v2020_v7  }
  0x45   :  { %188 = vperm.xlu0 %1787, %v2043_v11  }
  0x4c   :  { %194 = vperm.xlu2 %1786, %v2066_v15   ;;  %191 = vperm.xlu1 %1785, %v2038_v10  }
  0x4d   :  { %197 = vperm.xlu0 %1787, %v2061_v14  }
  0x54   :  { %203 = vperm.xlu2 %1786, %v2074_v16   ;;  %200 = vperm.xlu1 %1785, %v2056_v13  }
  0x55   :  { %1788 = vset.pattern.permute.xlu0 %v1934_v18 }
  0x56   :  { %270 = vperm.xlu0 %1788, %v1994_v3  }
  0x5c   :  { %1790 = vset.pattern.permute.xlu2 %v1934_v18  ;;  %1789 = vset.pattern.permute.xlu1 %v1934_v18  ;;  %v59_v19 = vpop.permute.xlu2 %58 }
  0x5d   :  { %276 = vperm.xlu2 %1790, %v1989_v2   ;;  %273 = vperm.xlu1 %1789, %v2012_v6   ;;  %vm97_vm2 = vcmp.eq.s32.totalorder %v59_v19, %v2122_v30 }
  0x5e   :  { %285 = vperm.xlu0 %1788, %v2002_v4   ;;  %v1481_v43 = vsel %vm97_vm2, 1.0, %v1937_v34 }
  0x64   :  { %v2097_v20 = vpop.permute.xlu2 %61 }
  0x65   :  { %282 = vperm.xlu2 %1790, %v1984_v1   ;;  %279 = vperm.xlu1 %1789, %v2007_v5  }
  0x66   :  { %294 = vperm.xlu0 %1788, %v2020_v7  }
  0x6c   :  { %v2102_v21 = vpop.permute.xlu2 %70 }
  0x6d   :  { %291 = vperm.xlu2 %1790, %v2025_v8   ;;  %288 = vperm.xlu1 %1789, %v2030_v9  }
  0x6e   :  { %303 = vperm.xlu0 %1788, %v2038_v10  }
  0x74   :  { %v2107_v22 = vpop.permute.xlu2 %79 }
  0x75   :  { %v2109_v23 = vpop.permute.xlu1 %52  ;;  %300 = vperm.xlu2 %1790, %v2043_v11   ;;  %297 = vperm.xlu1 %1789, %v2048_v12   ;;  %v47_v24 = vpop.permute.xlu0 %46 }
  0x76   :  { %312 = vperm.xlu0 %1788, %v2056_v13   ;;  %vm93_vm6 = vcmp.eq.s32.totalorder %v47_v24, %v2122_v30  ;;  %vm95_vm12 = vcmp.eq.s32.totalorder %v2109_v23, %v2122_v30 }
  0x77   :  { %v1477_v55 = vsel %vm93_vm6, 1.0, %v1937_v34  ;;  %v1479_v23 = vsel %vm95_vm12, 1.0, %v1937_v34  ;;  %vm101_vm6 = vcmp.eq.s32.totalorder %v2102_v21, %v2122_v30 }
  0x7c   :  { %v2114_v25 = vpop.permute.xlu2 %88 }
  0x7d   :  { %v2116_v27 = vpop.permute.xlu1 %55  ;;  %309 = vperm.xlu2 %1790, %v2061_v14   ;;  %306 = vperm.xlu1 %1789, %v2066_v15   ;;  %v50_v28 = vpop.permute.xlu0 %49 }
  0x7e   :  { %1793 = vset.pattern.permute.xlu0 %v1935_v29  ;;  %vm94_vm0 = vcmp.eq.s32.totalorder %v50_v28, %v2122_v30  ;;  %vm96_vm11 = vcmp.eq.s32.totalorder %v2116_v27, %v2122_v30 }
  0x7f   :  { %494 = vperm.xlu0 %1793, %v1994_v3   ;;  %v1478_v35 = vsel %vm94_vm0, 1.0, %v1937_v34  ;;  %v1480_v19 = vsel %vm96_vm11, 1.0, %v1937_v34  ;;  %vm104_vm11 = vcmp.eq.s32.totalorder %v2107_v22, %v2122_v30 }
  0x85   :  { %v2125_v31 = vpop.permute.xlu1 %67  ;;  %1791 = vset.pattern.permute.xlu2 %v1936_v32  ;;  %315 = vperm.xlu1 %1789, %v2074_v16   ;;  %v65_v33 = vpop.permute.xlu0 %64 }
  0x86   :  { %v162_v36 = vpop.permute.xlu2 %161  ;;  %382 = vperm.xlu2 %1791, %v1994_v3   ;;  %vm99_vm4 = vcmp.eq.s32.totalorder %v65_v33, %v2122_v30  ;;  %vm100_vm2 = vcmp.eq.s32.totalorder %v2125_v31, %v2122_v30 }
  0x87   :  { %vm206_vm1 = vcmp.eq.s32.totalorder %v162_v36, %v2122_v30  ;;  %1798 = vset.pattern.permute.xlu0 %v1938_v37  ;;  %v1483_v49 = vsel %vm99_vm4, 1.0, %v1937_v34 }
  0x88   :  { %v1494_v38 = vsel %vm206_vm1, 1.0, %v1937_v34  ;;  %721 = vperm.xlu0 %1798, %v2012_v6   ;;  %vm98_vm1 = vcmp.eq.s32.totalorder %v2097_v20, %v2122_v30  ;;  %v1484_v20 = vsel %vm100_vm2, 1.0, %v1937_v34 }
  0x89   :  { %v2135_v39 = vadd.f32 %v1494_v38, %v1478_v35 }
  0x8d   :  { %v2138_v40 = vpop.permute.xlu1 %76  ;;  %1792 = vset.pattern.permute.xlu1 %v1936_v32  ;;  %v74_v41 = vpop.permute.xlu0 %73 }
  0x8e   :  { %v171_v42 = vpop.permute.xlu2 %170  ;;  %391 = vperm.xlu2 %1791, %v2007_v5   ;;  %388 = vperm.xlu1 %1792, %v1989_v2   ;;  %vm102_vm7 = vcmp.eq.s32.totalorder %v74_v41, %v2122_v30 }
  0x8f   :  { %vm209_vm3 = vcmp.eq.s32.totalorder %v171_v42, %v2122_v30  ;;  %v1486_v56 = vsel %vm102_vm7, 1.0, %v1937_v34  ;;  %vm103_vm7 = vcmp.eq.s32.totalorder %v2138_v40, %v2122_v30 }
  0x90   :  { %v1497_v44 = vsel %vm209_vm3, 1.0, %v1937_v34  ;;  %1803 = vset.pattern.permute.xlu0 %v1939_v45 }
  0x91   :  { %v2147_v46 = vadd.f32 %v1497_v44, %v1481_v43  ;;  %612 = vperm.xlu0 %1803, %v1989_v2   ;;  %v1482_v43 = vsel %vm98_vm1, 1.0, %v1937_v34 }
  0x95   :  { %v2151_v47 = vpop.permute.xlu1 %85  ;;  %v83_v48 = vpop.permute.xlu0 %82 }
  0x96   :  { %v177_v50 = vpop.permute.xlu2 %176  ;;  %397 = vperm.xlu2 %1791, %v2002_v4   ;;  %394 = vperm.xlu1 %1792, %v1984_v1   ;;  %vm105_vm10 = vcmp.eq.s32.totalorder %v83_v48, %v2122_v30  ;;  %vm106_vm12 = vcmp.eq.s32.totalorder %v2151_v47, %v2122_v30 }
  0x97   :  { %vm211_vm5 = vcmp.eq.s32.totalorder %v177_v50, %v2122_v30  ;;  %v1489_v63 = vsel %vm105_vm10, 1.0, %v1937_v34 }
  0x98   :  { %v1499_v51 = vsel %vm211_vm5, 1.0, %v1937_v34 }
  0x99   :  { %v2158_v52 = vadd.f32 %v1499_v51, %v1483_v49  ;;  %1808 = vset.pattern.permute.xlu0 %v1940_v53 }
  0x9a   :  { %839 = vperm.xlu0 %1808, %v2007_v5  }
  0x9d   :  { %v92_v54 = vpop.permute.xlu0 %91 }
  0x9e   :  { %v186_v57 = vpop.permute.xlu2 %185  ;;  %1795 = vset.pattern.permute.xlu2 %v1939_v45  ;;  %1794 = vset.pattern.permute.xlu1 %v1935_v29  ;;  %v159_v58 = vpop.permute.xlu1 %158  ;;  %vm108_vm0 = vcmp.eq.s32.totalorder %v92_v54, %v2122_v30 }
  0x9f   :  { %vm214_vm8 = vcmp.eq.s32.totalorder %v186_v57, %v2122_v30  ;;  %vm205_vm9 = vcmp.eq.s32.totalorder %v159_v58, %v2122_v30  ;;  %606 = vperm.xlu2 %1795, %v1994_v3   ;;  %497 = vperm.xlu1 %1794, %v2012_v6   ;;  %v1492_v36 = vsel %vm108_vm0, 1.0, %v1937_v34  ;;  %v1485_v57 = vsel %vm101_vm6, 1.0, %v1937_v34 }
  0xa0   :  { %v1502_v59 = vsel %vm214_vm8, 1.0, %v1937_v34  ;;  %v1493_v60 = vsel %vm205_vm9, 1.0, %v1937_v34  ;;  %vm107_vm0 = vcmp.eq.s32.totalorder %v2114_v25, %v2122_v30 }
  0xa1   :  { %v2174_v61 = vadd.f32 %v1502_v59, %v1486_v56  ;;  %v2176_v62 = vadd.f32 %v1493_v60, %v1477_v55 }
  0xa2   :  { %1809 = vset.pattern.permute.xlu0 %v1936_v32 }
  0xa3   :  { %385 = vperm.xlu0 %1809, %v2012_v6  }
  0xa6   :  { %v195_v0 = vpop.permute.xlu2 %194  ;;  %v168_v17 = vpop.permute.xlu1 %167 }
  0xa7   :  { %vm217_vm13 = vcmp.eq.s32.totalorder %v195_v0, %v2122_v30  ;;  %vm208_vm14 = vcmp.eq.s32.totalorder %v168_v17, %v2122_v30  ;;  %v165_v18 = vpop.permute.xlu0 %164  ;;  %1797 = vset.pattern.permute.xlu2 %v1938_v37  ;;  %1796 = vset.pattern.permute.xlu1 %v1939_v45 }
  0xa8   :  { %v1505_v24 = vsel %vm217_vm13, 1.0, %v1937_v34  ;;  %v1496_v26 = vsel %vm208_vm14, 1.0, %v1937_v34  ;;  %vm207_vm15 = vcmp.eq.s32.totalorder %v165_v18, %v2122_v30  ;;  %718 = vperm.xlu2 %1797, %v1994_v3   ;;  %609 = vperm.xlu1 %1796, %v2012_v6   ;;  %v1488_v18 = vsel %vm104_vm11, 1.0, %v1937_v34 }
  0xa9   :  { %v2197_v27 = vadd.f32 %v1505_v24, %v1489_v63  ;;  %v2199_v28 = vadd.f32 %v1496_v26, %v1480_v19  ;;  %v1495_v33 = vsel %vm207_vm15, 1.0, %v1937_v34  ;;  %v1490_v24 = vsel %vm106_vm12, 1.0, %v1937_v34 }
  0xaa   :  { %v255_v35 = vadd.f32 %v1495_v33, %v1479_v23 }
  0xab   :  { %403 = vperm.xlu0 %1809, %v2025_v8  }
  0xae   :  { %v204_v38 = vpop.permute.xlu2 %203  ;;  %v174_v41 = vpop.permute.xlu1 %173 }
  0xaf   :  { %vm220_vm3 = vcmp.eq.s32.totalorder %v204_v38, %v2122_v30  ;;  %vm210_vm4 = vcmp.eq.s32.totalorder %v174_v41, %v2122_v30  ;;  %v180_v42 = vpop.permute.xlu0 %179 }
  0xb0   :  { %v1508_v44 = vsel %vm220_vm3, 1.0, %v1937_v34  ;;  %v1498_v48 = vsel %vm210_vm4, 1.0, %v1937_v34  ;;  %vm212_vm5 = vcmp.eq.s32.totalorder %v180_v42, %v2122_v30  ;;  %1800 = vset.pattern.permute.xlu2 %v1940_v53  ;;  %1799 = vset.pattern.permute.xlu1 %v1940_v53 }
  0xb1   :  { %v2218_v31 = vadd.f32 %v1508_v44, %v1492_v36  ;;  %v2220_v49 = vadd.f32 %v1498_v48, %v1482_v43  ;;  %v1500_v50 = vsel %vm212_vm5, 1.0, %v1937_v34  ;;  %833 = vperm.xlu2 %1800, %v2012_v6   ;;  %830 = vperm.xlu1 %1799, %v1994_v3   ;;  %v1487_v3 = vsel %vm103_vm7, 1.0, %v1937_v34 }
  0xb2   :  { %v260_v51 = vadd.f32 %v1500_v50, %v1484_v20 }
  0xb3   :  { %409 = vperm.xlu0 %1809, %v2048_v12  }
  0xb6   :  { %v183_v54 = vpop.permute.xlu1 %182 }
  0xb7   :  { %vm213_vm8 = vcmp.eq.s32.totalorder %v183_v54, %v2122_v30  ;;  %v189_v55 = vpop.permute.xlu0 %188  ;;  %v277_v56 = vpop.permute.xlu2 %276 }
  0xb8   :  { %v1501_v6 = vsel %vm213_vm8, 1.0, %v1937_v34  ;;  %vm215_vm9 = vcmp.eq.s32.totalorder %v189_v55, %v2122_v30  ;;  %vm319_vm10 = vcmp.eq.s32.totalorder %v277_v56, %v2122_v30 }
  0xb9   :  { %v2236_v58 = vadd.f32 %v1501_v6, %v1485_v57  ;;  %v1503_v21 = vsel %vm215_vm9, 1.0, %v1937_v34  ;;  %v1511_v40 = vsel %vm319_vm10, 1.0, %v1937_v34  ;;  %1802 = vset.pattern.permute.xlu2 %v1935_v29  ;;  %1801 = vset.pattern.permute.xlu1 %v1935_v29 }
  0xba   :  { %v263_v59 = vadd.f32 %v1503_v21, %v1487_v3  ;;  %v2242_v60 = vadd.f32 %v1511_v40, %v255_v35  ;;  %503 = vperm.xlu2 %1802, %v2007_v5   ;;  %500 = vperm.xlu1 %1801, %v1989_v2  }
  0xbb   :  { %421 = vperm.xlu0 %1809, %v2061_v14  }
  0xbe   :  { %v192_v63 = vpop.permute.xlu1 %191 }
  0xbf   :  { %vm216_vm13 = vcmp.eq.s32.totalorder %v192_v63, %v2122_v30  ;;  %v198_v0 = vpop.permute.xlu0 %197  ;;  %v283_v17 = vpop.permute.xlu2 %282 }
  0xc0   :  { %v1504_v19 = vsel %vm216_vm13, 1.0, %v1937_v34  ;;  %vm218_vm14 = vcmp.eq.s32.totalorder %v198_v0, %v2122_v30  ;;  %vm321_vm15 = vcmp.eq.s32.totalorder %v283_v17, %v2122_v30 }
  0xc1   :  { %v2257_v26 = vadd.f32 %v1504_v19, %v1488_v18  ;;  %v1506_v22 = vsel %vm218_vm14, 1.0, %v1937_v34  ;;  %v1513_v47 = vsel %vm321_vm15, 1.0, %v1937_v34 }
  0xc2   :  { %v266_v23 = vadd.f32 %v1506_v22, %v1490_v24  ;;  %v2262_v33 = vadd.f32 %v1513_v47, %v2147_v46  ;;  %1805 = vset.pattern.permute.xlu2 %v1938_v37  ;;  %1804 = vset.pattern.permute.xlu1 %v1939_v45  ;;  %v1491_v46 = vsel %vm107_vm0, 1.0, %v1937_v34 }
  0xc3   :  { %412 = vperm.xlu0 %1809, %v2043_v11   ;;  %724 = vperm.xlu2 %1805, %v1989_v2  }
  0xc4   :  { %615 = vperm.xlu1 %1804, %v2007_v5  }
  0xc6   :  { %v201_v35 = vpop.permute.xlu1 %200 }
  0xc7   :  { %vm219_vm1 = vcmp.eq.s32.totalorder %v201_v35, %v2122_v30  ;;  %v292_v36 = vpop.permute.xlu2 %291 }
  0xc8   :  { %v1507_v38 = vsel %vm219_vm1, 1.0, %v1937_v34  ;;  %vm324_vm2 = vcmp.eq.s32.totalorder %v292_v36, %v2122_v30  ;;  %v271_v41 = vpop.permute.xlu0 %270  ;;  %v2361_v36 = vld [vmem:[%s2903_s2 + $0x38] sm:$0xff] }
  0xc9   :  { %v2275_v42 = vadd.f32 %v1507_v38, %v1491_v46  ;;  %v1516_v43 = vsel %vm324_vm2, 1.0, %v1937_v34  ;;  %vm317_vm3 = vcmp.eq.s32.totalorder %v271_v41, %v2122_v30  ;;  %1190 = vmatpush.bf16.msra.mxu1 %v2361_v36  ;;  %v2373_v38 = vld [vmem:[%s2903_s2 + $0x30] sm:$0xff] }
  0xca   :  { %v2279_v44 = vadd.f32 %v1516_v43, %v260_v51  ;;  %v1509_v25 = vsel %vm317_vm3, 1.0, %v1937_v34 }
  0xcb   :  { %v2283_v48 = vadd.f32 %v1509_v25, %v2176_v62  ;;  %1807 = vset.pattern.permute.xlu2 %v1940_v53  ;;  %1838 = vset.pattern.permute.xlu0 %v1938_v37 }
  0xcc   :  { %1806 = vset.pattern.permute.xlu1 %v1938_v37  ;;  %836 = vperm.xlu2 %1807, %v1989_v2  }
  0xcd   :  { %727 = vperm.xlu1 %1806, %v2007_v5   ;;  %730 = vperm.xlu0 %1838, %v1984_v1  }
  0xce   :  { %1191 = vmatpush.bf16.msra.mxu1 %v2373_v38 }
  0xcf   :  { %v301_v20 = vpop.permute.xlu2 %300  ;;  %v274_v50 = vpop.permute.xlu1 %273 }
  0xd0   :  { %vm327_vm4 = vcmp.eq.s32.totalorder %v301_v20, %v2122_v30  ;;  %vm318_vm5 = vcmp.eq.s32.totalorder %v274_v50, %v2122_v30  ;;  %v286_v62 = vpop.permute.xlu0 %285 }
  0xd1   :  { %v1519_v51 = vsel %vm327_vm4, 1.0, %v1937_v34  ;;  %v1510_v54 = vsel %vm318_vm5, 1.0, %v1937_v34  ;;  %vm322_vm6 = vcmp.eq.s32.totalorder %v286_v62, %v2122_v30  ;;  %v1746_v62 = vld [vmem:[%s2902_s3 + $0x28] sm:$0xff] }
  0xd2   :  { %v2296_v55 = vadd.f32 %v1519_v51, %v263_v59  ;;  %v2299_v2 = vadd.f32 %v1510_v54, %v2135_v39  ;;  %v1514_v5 = vsel %vm322_vm6, 1.0, %v1937_v34  ;;  %v2395_v51 = vld [vmem:[%s2903_s2 + $0x28] sm:$0xff] }
  0xd3   :  { %v2303_v56 = vadd.f32 %v1514_v5, %v2220_v49  ;;  %1192 = vmatpush.bf16.msra.mxu1 %v2395_v51  ;;  %v2409_v5 = vld [vmem:[%s2903_s2 + $0x20] sm:$0xff] }
  0xd4   :  { %1811 = vset.pattern.permute.xlu2 %v1935_v29 }
  0xd5   :  { %1810 = vset.pattern.permute.xlu1 %v1935_v29  ;;  %509 = vperm.xlu2 %1811, %v2002_v4  }
  0xd6   :  { %506 = vperm.xlu1 %1810, %v1984_v1   ;;  %736 = vperm.xlu0 %1838, %v2030_v9  }
  0xd7   :  { %v310_v57 = vpop.permute.xlu2 %309  ;;  %v280_v6 = vpop.permute.xlu1 %279  ;;  %1193 = vmatpush.bf16.msra.mxu1 %v2409_v5 }
  0xd8   :  { %vm330_vm7 = vcmp.eq.s32.totalorder %v310_v57, %v2122_v30  ;;  %vm320_vm8 = vcmp.eq.s32.totalorder %v280_v6, %v2122_v30  ;;  %v295_v39 = vpop.permute.xlu0 %294  ;;  %v1744_v6 = vld [vmem:[%s2902_s3 + $0x18] sm:$0xff] }
  0xd9   :  { %v1522_v49 = vsel %vm330_vm7, 1.0, %v1937_v34  ;;  %v1512_v3 = vsel %vm320_vm8, 1.0, %v1937_v34  ;;  %vm325_vm9 = vcmp.eq.s32.totalorder %v295_v39, %v2122_v30  ;;  %v2429_v39 = vld [vmem:[%s2903_s2 + $0x18] sm:$0xff] }
  0xda   :  { %v2315_v21 = vadd.f32 %v1522_v49, %v266_v23  ;;  %v2318_v40 = vadd.f32 %v1512_v3, %v2199_v28  ;;  %v1517_v59 = vsel %vm325_vm9, 1.0, %v1937_v34  ;;  %v2442_v3 = vld [vmem:[%s2903_s2 + $0x10] sm:$0xff] }
  0xdb   :  { %v2322_v63 = vadd.f32 %v1517_v59, %v2236_v58  ;;  %1194 = vmatpush.bf16.msra.mxu1 %v2429_v39 }
  0xdd   :  { %1813 = vset.pattern.permute.xlu2 %v1939_v45 }
  0xde   :  { %1812 = vset.pattern.permute.xlu1 %v1939_v45  ;;  %621 = vperm.xlu2 %1813, %v2002_v4  }
  0xdf   :  { %618 = vperm.xlu1 %1812, %v1984_v1   ;;  %v289_v0 = vpop.permute.xlu1 %288  ;;  %742 = vperm.xlu0 %1838, %v2020_v7  }
  0xe0   :  { %vm323_vm10 = vcmp.eq.s32.totalorder %v289_v0, %v2122_v30  ;;  %v304_v28 = vpop.permute.xlu0 %303  ;;  %v2330_v17 = vpop.permute.xlu2 %382  ;;  %v1742_v0 = vld [vmem:[%s2902_s3 + $0x8] sm:$0xff]  ;;  %1195 = vmatpush.bf16.msra.mxu1 %v2442_v3 }
  0xe1   :  { %v1515_v18 = vsel %vm323_vm10, 1.0, %v1937_v34  ;;  %vm328_vm11 = vcmp.eq.s32.totalorder %v304_v28, %v2122_v30  ;;  %v2459_v28 = vld [vmem:[%s2903_s2 + $0x8] sm:$0xff]  ;;  %vm429_vm3 = vcmp.eq.s32.totalorder %v2330_v17, %v2122_v30 }
  0xe2   :  { %v2335_v58 = vadd.f32 %v1515_v18, %v2158_v52  ;;  %v1520_v19 = vsel %vm328_vm11, 1.0, %v1937_v34 }
  0xe3   :  { %v2339_v24 = vadd.f32 %v1520_v19, %v2257_v26  ;;  %v1741_v19 = vld [vmem:[%s2902_s3] sm:$0xff] }
  0xe4   :  { %1196 = vmatpush.bf16.msra.mxu1 %v2459_v28 }
  0xe6   :  { %1815 = vset.pattern.permute.xlu2 %v1940_v53 }
  0xe7   :  { %1814 = vset.pattern.permute.xlu1 %v1938_v37  ;;  %842 = vperm.xlu2 %1815, %v1984_v1   ;;  %v298_v22 = vpop.permute.xlu1 %297  ;;  %v1748_v1 = vld [vmem:[%s2902_s3 + $0x38] sm:$0xff] }
  0xe8   :  { %733 = vperm.xlu1 %1814, %v2002_v4   ;;  %vm326_vm12 = vcmp.eq.s32.totalorder %v298_v22, %v2122_v30  ;;  %v313_v47 = vpop.permute.xlu0 %312  ;;  %v2346_v23 = vpop.permute.xlu2 %391  ;;  %757 = vperm.xlu0 %1838, %v2061_v14   ;;  %v2470_v22 = vld [vmem:[%s2903_s2] sm:$0xff] }
  0xe9   :  { %v1518_v52 = vsel %vm326_vm12, 1.0, %v1937_v34  ;;  %vm331_vm13 = vcmp.eq.s32.totalorder %v313_v47, %v2122_v30  ;;  %1093 = vmatpush.bf16.msra.mxu0 %v1748_v1  ;;  %1753 = vmatpush.bf16.msra.mxu3 %v1748_v1 }
  0xea   :  { %v2352_v26 = vadd.f32 %v1518_v52, %v2174_v61  ;;  %v1523_v35 = vsel %vm331_vm13, 1.0, %v1937_v34  ;;  %v1747_v61 = vld [vmem:[%s2902_s3 + $0x30] sm:$0xff]  ;;  %v1733_v52 = vld [vmem:[%s2904_s1] sm:$0xff]  ;;  %1197 = vmatpush.bf16.msra.mxu1 %v2470_v22 }
  0xeb   :  { %v2364_v46 = vadd.f32 %v1523_v35, %v2275_v42 }
  0xed   :  { %1094 = vmatpush.bf16.msra.mxu0 %v1747_v61  ;;  %1754 = vmatpush.bf16.msra.mxu3 %v1747_v61 }
  0xef   :  { %1817 = vset.pattern.permute.xlu2 %v1936_v32  ;;  %v307_v41 = vpop.permute.xlu1 %306 }
  0xf0   :  { %1816 = vset.pattern.permute.xlu1 %v1940_v53  ;;  %vm329_vm14 = vcmp.eq.s32.totalorder %v307_v41, %v2122_v30  ;;  %400 = vperm.xlu2 %1817, %v2030_v9   ;;  %v398_v42 = vpop.permute.xlu2 %397 }
  0xf1   :  { %v1521_v43 = vsel %vm329_vm14, 1.0, %v1937_v34  ;;  %vm434_vm15 = vcmp.eq.s32.totalorder %v398_v42, %v2122_v30  ;;  %845 = vperm.xlu1 %1816, %v2002_v4   ;;  %v2386_v50 = vpop.permute.xlu0 %494  ;;  %1849 = vset.pattern.permute.xlu0 %v1940_v53 }
  0xf2   :  { %v2383_v25 = vadd.f32 %v1521_v43, %v2197_v27  ;;  %v1530_v20 = vsel %vm434_vm15, 1.0, %v1937_v34  ;;  %863 = vperm.xlu0 %1849, %v2038_v10   ;;  %1095 = vmatpush.bf16.msra.mxu0 %v1746_v62  ;;  %v1745_v27 = vld [vmem:[%s2902_s3 + $0x20] sm:$0xff]  ;;  %vm541_vm5 = vcmp.eq.s32.totalorder %v2386_v50, %v2122_v30 }
  0xf3   :  { %v2399_v4 = vadd.f32 %v1530_v20, %v2303_v56  ;;  %1755 = vmatpush.bf16.msra.mxu3 %v1746_v62  ;;  %v1541_v42 = vsel %vm541_vm5, 1.0, %v1937_v34 }
  0xf6   :  { %1096 = vmatpush.bf16.msra.mxu0 %v1745_v27 }
  0xf7   :  { %v316_v54 = vpop.permute.xlu1 %315  ;;  %1756 = vmatpush.bf16.msra.mxu3 %v1745_v27 }
  0xf8   :  { %vm332_vm0 = vcmp.eq.s32.totalorder %v316_v54, %v2122_v30  ;;  %1819 = vset.pattern.permute.xlu2 %v1935_v29 }
  0xf9   :  { %v1524_v10 = vsel %vm332_vm0, 1.0, %v1937_v34  ;;  %1818 = vset.pattern.permute.xlu1 %v1935_v29  ;;  %515 = vperm.xlu2 %1819, %v2025_v8   ;;  %v2445_v59 = vpop.permute.xlu2 %606  ;;  %vm432_vm0 = vcmp.eq.s32.totalorder %v2346_v23, %v2122_v30 }
  0xfa   :  { %v2417_v56 = vadd.f32 %v1524_v10, %v2218_v31  ;;  %512 = vperm.xlu1 %1818, %v2030_v9   ;;  %v2420_v57 = vpop.permute.xlu0 %721  ;;  %1850 = vset.pattern.permute.xlu0 %v1939_v45  ;;  %v1743_v31 = vld [vmem:[%s2902_s3 + $0x10] sm:$0xff]  ;;  %vm653_vm7 = vcmp.eq.s32.totalorder %v2445_v59, %v2122_v30 }
  0xfb   :  { %636 = vperm.xlu0 %1850, %v2043_v11   ;;  %1097 = vmatpush.bf16.msra.mxu0 %v1744_v6  ;;  %vm766_vm8 = vcmp.eq.s32.totalorder %v2420_v57, %v2122_v30 }
  0xfc   :  { %1757 = vmatpush.bf16.msra.mxu3 %v1744_v6  ;;  %v1574_v27 = vsel %vm766_vm8, 1.0, %v1937_v34 }
  0xff   :  { %1098 = vmatpush.bf16.msra.mxu0 %v1743_v31 }
 0x100   :  { %v2437_v49 = vpop.permute.xlu1 %388  ;;  %1758 = vmatpush.bf16.msra.mxu3 %v1743_v31  ;;  %v1734_v31 = vld [vmem:[%s2904_s1 + $0x8] sm:$0xff] }
 0x101   :  { %1821 = vset.pattern.permute.xlu2 %v1939_v45  ;;  %vm431_vm14 = vcmp.eq.s32.totalorder %v2437_v49, %v2122_v30 }
 0x102   :  { %1820 = vset.pattern.permute.xlu1 %v1939_v45  ;;  %627 = vperm.xlu2 %1821, %v2025_v8   ;;  %v719_v35 = vpop.permute.xlu2 %718 }
 0x103   :  { %624 = vperm.xlu1 %1820, %v2030_v9   ;;  %v2450_v11 = vpop.permute.xlu0 %612  ;;  %648 = vperm.xlu0 %1850, %v2056_v13   ;;  %vm765_vm9 = vcmp.eq.s32.totalorder %v719_v35, %v2122_v30 }
 0x104   :  { %1099 = vmatpush.bf16.msra.mxu0 %v1742_v0  ;;  %1759 = vmatpush.bf16.msra.mxu3 %v1742_v0 }
 0x108   :  { %v395_v18 = vpop.permute.xlu1 %394  ;;  %1100 = vmatpush.bf16.msra.mxu0 %v1741_v19  ;;  %1760 = vmatpush.bf16.msra.mxu3 %v1741_v19 }
 0x109   :  { %vm433_vm1 = vcmp.eq.s32.totalorder %v395_v18, %v2122_v30 }
 0x10a   :  { %v1529_v47 = vsel %vm433_vm1, 1.0, %v1937_v34  ;;  %1823 = vset.pattern.permute.xlu2 %v1940_v53  ;;  %vm655_vm1 = vcmp.eq.s32.totalorder %v2450_v11, %v2122_v30 }
 0x10b   :  { %v2475_v13 = vadd.f32 %v1529_v47, %v2262_v33  ;;  %1822 = vset.pattern.permute.xlu1 %v1938_v37  ;;  %848 = vperm.xlu2 %1823, %v2030_v9   ;;  %v834_v33 = vpop.permute.xlu2 %833  ;;  %v1559_v23 = vsel %vm655_vm1, 1.0, %v1937_v34 }
 0x10c   :  { %739 = vperm.xlu1 %1822, %v2025_v8   ;;  %v2483_v1 = vpop.permute.xlu0 %839  ;;  %1859 = vset.pattern.permute.xlu0 %v1940_v53  ;;  %vm878_vm10 = vcmp.eq.s32.totalorder %v834_v33, %v2122_v30 }
 0x10d   :  { %875 = vperm.xlu0 %1859, %v2074_v16   ;;  %1101 = vmatmul.bf16.vlgmr.msra.gmra.mxu0 %v1733_v52  ;;  %v1590_v57 = vsel %vm878_vm10, 1.0, %v1937_v34 }
 0x10e   :  { %1761 = vmatpush.bf16.msrb.mxu3 %v2361_v36 }
 0x111   :  { %v498_v9 = vpop.permute.xlu1 %497 }
 0x112   :  { %1762 = vmatpush.bf16.msrb.mxu3 %v2373_v38  ;;  %vm542_vm4 = vcmp.eq.s32.totalorder %v498_v9, %v2122_v30 }
 0x113   :  { %1825 = vset.pattern.permute.xlu2 %v1936_v32  ;;  %v1542_v41 = vsel %vm542_vm4, 1.0, %v1937_v34 }
 0x114   :  { %1824 = vset.pattern.permute.xlu1 %v1940_v53  ;;  %406 = vperm.xlu2 %1825, %v2020_v7   ;;  %v2520_v50 = vpop.permute.xlu2 %503 }
 0x115   :  { %851 = vperm.xlu1 %1824, %v2025_v8   ;;  %v386_v61 = vpop.permute.xlu0 %385  ;;  %v1525_v8 = vsel %vm429_vm3, 1.0, %v1937_v34  ;;  %vm544_vm3 = vcmp.eq.s32.totalorder %v2520_v50, %v2122_v30 }
 0x116   :  { %vm430_vm2 = vcmp.eq.s32.totalorder %v386_v61, %v2122_v30  ;;  %1763 = vmatpush.bf16.msrb.mxu3 %v2395_v51  ;;  %v477_v20 = vadd.f32 %v1525_v8, %v2283_v48  ;;  %v1557_v51 = vsel %vm653_vm7, 1.0, %v1937_v34 }
 0x117   :  { %v1526_v16 = vsel %vm430_vm2, 1.0, %v1937_v34 }
 0x118   :  { %v478_v36 = vadd.f32 %v1526_v16, %v2299_v2  ;;  %v589_v54 = vadd.f32 %v1541_v42, %v477_v20 }
 0x11a   :  { %v610_v38 = vpop.permute.xlu1 %609  ;;  %1764 = vmatpush.bf16.msrb.mxu3 %v2409_v5  ;;  %v590_v17 = vadd.f32 %v1542_v41, %v478_v36  ;;  %v1573_v5 = vsel %vm765_vm9, 1.0, %v1937_v34  ;;  %v701_v10 = vadd.f32 %v1557_v51, %v589_v54  ;;  %v1544_v41 = vsel %vm544_vm3, 1.0, %v1937_v34 }
 0x11b   :  { %vm654_vm6 = vcmp.eq.s32.totalorder %v610_v38, %v2122_v30 }
 0x11c   :  { %v1558_v2 = vsel %vm654_vm6, 1.0, %v1937_v34  ;;  %1827 = vset.pattern.permute.xlu2 %v1935_v29  ;;  %v813_v59 = vadd.f32 %v1573_v5, %v701_v10  ;;  %vm880_vm6 = vcmp.eq.s32.totalorder %v2483_v1, %v2122_v30 }
 0x11d   :  { %1826 = vset.pattern.permute.xlu1 %v1935_v29  ;;  %v2515_v43 = vpop.permute.xlu0 %403  ;;  %521 = vperm.xlu2 %1827, %v2048_v12   ;;  %v702_v62 = vadd.f32 %v1558_v2, %v590_v17  ;;  %v725_v18 = vpop.permute.xlu2 %724 }
 0x11e   :  { %518 = vperm.xlu1 %1826, %v2020_v7   ;;  %1765 = vmatpush.bf16.msrb.mxu3 %v2429_v39  ;;  %vm767_vm4 = vcmp.eq.s32.totalorder %v725_v18, %v2122_v30  ;;  %vm436_vm3 = vcmp.eq.s32.totalorder %v2515_v43, %v2122_v30 }
 0x11f   :  { %v814_v48 = vadd.f32 %v1574_v27, %v702_v62  ;;  %1106 = vmatmul.bf16.gmra.mxu0 %v1734_v31  ;;  %v1575_v2 = vsel %vm767_vm4, 1.0, %v1937_v34 }
 0x121   :  { %v926_v47 = vadd.f32 %v1590_v57, %v814_v48  ;;  %v1735_v57 = vld [vmem:[%s2904_s1 + $0x10] sm:$0xff] }
 0x122   :  { %1766 = vmatpush.bf16.msrb.mxu3 %v2442_v3 }
 0x123   :  { %v831_v6 = vpop.permute.xlu1 %830 }
 0x124   :  { %vm877_vm11 = vcmp.eq.s32.totalorder %v831_v6, %v2122_v30 }
 0x125   :  { %v1589_v39 = vsel %vm877_vm11, 1.0, %v1937_v34  ;;  %v410_v0 = vpop.permute.xlu0 %409  ;;  %1829 = vset.pattern.permute.xlu2 %v1939_v45 }
 0x126   :  { %v925_v19 = vadd.f32 %v1589_v39, %v813_v59  ;;  %vm438_vm12 = vcmp.eq.s32.totalorder %v410_v0, %v2122_v30  ;;  %1828 = vset.pattern.permute.xlu1 %v1939_v45  ;;  %633 = vperm.xlu2 %1829, %v2048_v12   ;;  %v1926_v39 = vld [vmem:[%s2901_s0 + $0x60] sm:$0xff]  ;;  %v1927_v0 = vld [vmem:[%s2901_s0 + $0x58] sm:$0xff] }
 0x127   :  { %v1534_v3 = vsel %vm438_vm12, 1.0, %v1937_v34  ;;  %630 = vperm.xlu1 %1828, %v2020_v7   ;;  %1767 = vmatpush.bf16.msrb.mxu3 %v2459_v28 }
 0x128   :  { %v2543_v52 = vadd.f32 %v1534_v3, %v2352_v26  ;;  %v941_v35 = vpack.c.bf16 %v926_v47, %v925_v19  ;;  %v837_v26 = vpop.permute.xlu2 %836 }
 0x129   :  { %vm879_vm7 = vcmp.eq.s32.totalorder %v837_v26, %v2122_v30 }
 0x12a   :  { %1198 = vmatmul.bf16.vlgmr.msra.gmra.mxu1 %v941_v35  ;;  %v1591_v51 = vsel %vm879_vm7, 1.0, %v1937_v34 }
 0x12b   :  { %1768 = vmatpush.bf16.msrb.mxu3 %v2470_v22  ;;  %v1527_v22 = vsel %vm431_vm14, 1.0, %v1937_v34 }
 0x12c   :  { %v501_v9 = vpop.permute.xlu1 %500 }
 0x12d   :  { %v422_v33 = vpop.permute.xlu0 %421  ;;  %vm543_vm15 = vcmp.eq.s32.totalorder %v501_v9, %v2122_v30  ;;  %v1928_v9 = vld [vmem:[%s2901_s0 + $0x50] sm:$0xff] }
 0x12e   :  { %vm442_vm13 = vcmp.eq.s32.totalorder %v422_v33, %v2122_v30  ;;  %1831 = vset.pattern.permute.xlu2 %v1940_v53  ;;  %v1543_v16 = vsel %vm543_vm15, 1.0, %v1937_v34 }
 0x12f   :  { %v1538_v61 = vsel %vm442_vm13, 1.0, %v1937_v34  ;;  %1830 = vset.pattern.permute.xlu1 %v1938_v37  ;;  %854 = vperm.xlu2 %1831, %v2020_v7   ;;  %v479_v7 = vadd.f32 %v1527_v22, %v2242_v60  ;;  %v1528_v60 = vsel %vm432_vm0, 1.0, %v1937_v34 }
 0x130   :  { %v2554_v28 = vadd.f32 %v1538_v61, %v2315_v21  ;;  %745 = vperm.xlu1 %1830, %v2048_v12   ;;  %v510_v11 = vpop.permute.xlu2 %509  ;;  %1111 = vmatmul.bf16.gmra.mxu0 %v1735_v57 }
 0x131   :  { %v591_v38 = vadd.f32 %v1543_v16, %v479_v7  ;;  %vm546_vm11 = vcmp.eq.s32.totalorder %v510_v11, %v2122_v30 }
 0x132   :  { %v1546_v35 = vsel %vm546_vm11, 1.0, %v1937_v34 }
 0x133   :  { %v703_v17 = vadd.f32 %v1559_v23, %v591_v38 }
 0x135   :  { %v413_v36 = vpop.permute.xlu0 %412  ;;  %v815_v62 = vadd.f32 %v1575_v2, %v703_v17  ;;  %v1736_v17 = vld [vmem:[%s2904_s1 + $0x18] sm:$0xff] }
 0x136   :  { %vm439_vm2 = vcmp.eq.s32.totalorder %v413_v36, %v2122_v30  ;;  %v616_v21 = vpop.permute.xlu1 %615 }
 0x137   :  { %v1535_v49 = vsel %vm439_vm2, 1.0, %v1937_v34  ;;  %1833 = vset.pattern.permute.xlu2 %v1936_v32  ;;  %vm656_vm5 = vcmp.eq.s32.totalorder %v616_v21, %v2122_v30  ;;  %v927_v5 = vadd.f32 %v1591_v51, %v815_v62 }
 0x138   :  { %v2571_v8 = vadd.f32 %v1535_v49, %v2296_v55  ;;  %1832 = vset.pattern.permute.xlu1 %v1940_v53  ;;  %418 = vperm.xlu2 %1833, %v2066_v15   ;;  %v480_v55 = vadd.f32 %v1528_v60, %v2318_v40  ;;  %v1560_v42 = vsel %vm656_vm5, 1.0, %v1937_v34  ;;  %v1592_v40 = vsel %vm880_vm6, 1.0, %v1937_v34  ;;  %v622_v54 = vpop.permute.xlu2 %621 }
 0x139   :  { %857 = vperm.xlu1 %1832, %v2048_v12   ;;  %vm658_vm12 = vcmp.eq.s32.totalorder %v622_v54, %v2122_v30 }
 0x13a   :  { %v592_v20 = vadd.f32 %v1544_v41, %v480_v55  ;;  %v1562_v61 = vsel %vm658_vm12, 1.0, %v1937_v34 }
 0x13c   :  { %v704_v50 = vadd.f32 %v1560_v42, %v592_v20 }
 0x13f   :  { %v728_v12 = vpop.permute.xlu1 %727  ;;  %v731_v18 = vpop.permute.xlu0 %730 }
 0x140   :  { %vm768_vm8 = vcmp.eq.s32.totalorder %v728_v12, %v2122_v30  ;;  %1835 = vset.pattern.permute.xlu2 %v1935_v29  ;;  %vm769_vm13 = vcmp.eq.s32.totalorder %v731_v18, %v2122_v30  ;;  %1116 = vmatmul.bf16.gmra.mxu0 %v1736_v17 }
 0x141   :  { %v1576_v27 = vsel %vm768_vm8, 1.0, %v1937_v34  ;;  %1834 = vset.pattern.permute.xlu1 %v1935_v29  ;;  %533 = vperm.xlu2 %1835, %v2061_v14   ;;  %v843_v31 = vpop.permute.xlu2 %842  ;;  %v1577_v26 = vsel %vm769_vm13, 1.0, %v1937_v34 }
 0x142   :  { %v816_v1 = vadd.f32 %v1576_v27, %v704_v50  ;;  %530 = vperm.xlu1 %1834, %v2066_v15   ;;  %vm881_vm15 = vcmp.eq.s32.totalorder %v843_v31, %v2122_v30 }
 0x143   :  { %v1593_v21 = vsel %vm881_vm15, 1.0, %v1937_v34 }
 0x144   :  { %v928_v10 = vadd.f32 %v1592_v40, %v816_v1  ;;  %v1532_v1 = vsel %vm436_vm3, 1.0, %v1937_v34 }
 0x146   :  { %v942_v48 = vpack.c.bf16 %v928_v10, %v927_v5  ;;  %v1931_v10 = vld [vmem:[%s2901_s0 + $0x70] sm:$0xff] }
 0x148   :  { %v507_v6 = vpop.permute.xlu1 %506  ;;  %1203 = vmatmul.bf16.gmra.mxu1 %v942_v48  ;;  %v737_v40 = vpop.permute.xlu0 %736  ;;  %v484_v48 = vadd.f32 %v1532_v1, %v2279_v44 }
 0x149   :  { %1837 = vset.pattern.permute.xlu2 %v1939_v45  ;;  %vm545_vm9 = vcmp.eq.s32.totalorder %v507_v6, %v2122_v30  ;;  %vm771_vm7 = vcmp.eq.s32.totalorder %v737_v40, %v2122_v30 }
 0x14a   :  { %1836 = vset.pattern.permute.xlu1 %v1939_v45  ;;  %645 = vperm.xlu2 %1837, %v2061_v14   ;;  %v401_v14 = vpop.permute.xlu2 %400 }
 0x14b   :  { %642 = vperm.xlu1 %1836, %v2066_v15   ;;  %v1545_v15 = vsel %vm545_vm9, 1.0, %v1937_v34  ;;  %vm435_vm1 = vcmp.eq.s32.totalorder %v401_v14, %v2122_v30 }
 0x14c   :  { %v593_v3 = vadd.f32 %v1545_v15, %v2475_v13  ;;  %v594_v13 = vadd.f32 %v1546_v35, %v2399_v4  ;;  %v1929_v4 = vld [vmem:[%s2901_s0 + $0x68] sm:$0xff]  ;;  %v1531_v12 = vsel %vm435_vm1, 1.0, %v1937_v34 }
 0x14d   :  { %v483_v51 = vadd.f32 %v1531_v12, %v2335_v58  ;;  %v1930_v58 = vld [vmem:[%s2901_s0 + $0x78] sm:$0xff] }
 0x14e   :  { %v706_v36 = vadd.f32 %v1562_v61, %v594_v13  ;;  %v1737_v61 = vld [vmem:[%s2904_s1 + $0x20] sm:$0xff]  ;;  %v1752_v13 = vld [vmem:[%s2906_s5 + $0x18] sm:$0xff] }
 0x14f   :  { %1412 = vmatpush.bf16.msra.mxu2 %v1752_v13 }
 0x150   :  { %1121 = vmatmul.bf16.gmra.mxu0 %v1737_v61 }
 0x151   :  { %v619_v59 = vpop.permute.xlu1 %618 }
 0x152   :  { %1840 = vset.pattern.permute.xlu2 %v1938_v37  ;;  %vm657_vm10 = vcmp.eq.s32.totalorder %v619_v59, %v2122_v30 }
 0x153   :  { %1839 = vset.pattern.permute.xlu1 %v1936_v32  ;;  %754 = vperm.xlu2 %1840, %v1926_v39   ;;  %v1561_v47 = vsel %vm657_vm10, 1.0, %v1937_v34  ;;  %v516_v22 = vpop.permute.xlu2 %515 }
 0x154   :  { %415 = vperm.xlu1 %1839, %v1927_v0   ;;  %v705_v33 = vadd.f32 %v1561_v47, %v593_v3  ;;  %vm548_vm5 = vcmp.eq.s32.totalorder %v516_v22, %v2122_v30 }
 0x155   :  { %v1548_v5 = vsel %vm548_vm5, 1.0, %v1937_v34 }
 0x156   :  { %v817_v7 = vadd.f32 %v1577_v26, %v705_v33  ;;  %v596_v31 = vadd.f32 %v1548_v5, %v484_v48  ;;  %v1740_v5 = vld [vmem:[%s2904_s1 + $0x38] sm:$0xff] }
 0x158   :  { %v929_v11 = vadd.f32 %v1593_v21, %v817_v7 }
 0x15a   :  { %v734_v19 = vpop.permute.xlu1 %733 }
 0x15b   :  { %1842 = vset.pattern.permute.xlu2 %v1935_v29  ;;  %vm770_vm14 = vcmp.eq.s32.totalorder %v734_v19, %v2122_v30 }
 0x15c   :  { %1841 = vset.pattern.permute.xlu1 %v1935_v29  ;;  %527 = vperm.xlu2 %1842, %v1927_v0   ;;  %v1578_v16 = vsel %vm770_vm14, 1.0, %v1937_v34  ;;  %v628_v55 = vpop.permute.xlu2 %627 }
 0x15d   :  { %524 = vperm.xlu1 %1841, %v1928_v9   ;;  %v818_v38 = vadd.f32 %v1578_v16, %v706_v36  ;;  %vm660_vm6 = vcmp.eq.s32.totalorder %v628_v55, %v2122_v30  ;;  %v743_v16 = vpop.permute.xlu0 %742 }
 0x15e   :  { %v1564_v6 = vsel %vm660_vm6, 1.0, %v1937_v34 }
 0x163   :  { %v846_v49 = vpop.permute.xlu1 %845 }
 0x164   :  { %vm882_vm0 = vcmp.eq.s32.totalorder %v846_v49, %v2122_v30  ;;  %1844 = vset.pattern.permute.xlu2 %v1940_v53  ;;  %v1750_v49 = vld [vmem:[%s2906_s5 + $0x8] sm:$0xff] }
 0x165   :  { %v1594_v60 = vsel %vm882_vm0, 1.0, %v1937_v34  ;;  %1843 = vset.pattern.permute.xlu1 %v1940_v53  ;;  %869 = vperm.xlu2 %1844, %v1929_v4   ;;  %v849_v42 = vpop.permute.xlu2 %848  ;;  %vm773_vm0 = vcmp.eq.s32.totalorder %v743_v16, %v2122_v30 }
 0x166   :  { %v930_v23 = vadd.f32 %v1594_v60, %v818_v38  ;;  %866 = vperm.xlu1 %1843, %v1926_v39   ;;  %vm883_vm9 = vcmp.eq.s32.totalorder %v849_v42, %v2122_v30  ;;  %v708_v39 = vadd.f32 %v1564_v6, %v596_v31  ;;  %v1581_v17 = vsel %vm773_vm0, 1.0, %v1937_v34 }
 0x167   :  { %v1595_v15 = vsel %vm883_vm9, 1.0, %v1937_v34 }
 0x168   :  { %v943_v41 = vpack.c.bf16 %v930_v23, %v929_v11  ;;  %v2717_v11 = vld [vmem:[%s2905_s4] ss:$0 sm:$0xff] }
 0x16a   :  { %1208 = vmatmul.bf16.gmra.mxu1 %v943_v41  ;;  %v1749_v41 = vld [vmem:[%s2906_s5] sm:$0xff] }
 0x16c   :  { %v513_v2 = vpop.permute.xlu1 %512 }
 0x16d   :  { %1846 = vset.pattern.permute.xlu2 %v1938_v37  ;;  %vm547_vm2 = vcmp.eq.s32.totalorder %v513_v2, %v2122_v30 }
 0x16e   :  { %1845 = vset.pattern.permute.xlu1 %v1939_v45  ;;  %748 = vperm.xlu2 %1846, %v1928_v9   ;;  %v2650_v50 = vpop.permute.xlu2 %406  ;;  %v1547_v62 = vsel %vm547_vm2, 1.0, %v1937_v34 }
 0x16f   :  { %639 = vperm.xlu1 %1845, %v1927_v0   ;;  %v595_v43 = vadd.f32 %v1547_v62, %v483_v51  ;;  %vm437_vm11 = vcmp.eq.s32.totalorder %v2650_v50, %v2122_v30 }
 0x170   :  { %v1533_v22 = vsel %vm437_vm11, 1.0, %v1937_v34 }
 0x171   :  { %v485_v36 = vadd.f32 %v1533_v22, %v2322_v63 }
 0x175   :  { %v625_v20 = vpop.permute.xlu1 %624 }
 0x176   :  { %1848 = vset.pattern.permute.xlu2 %v1940_v53  ;;  %vm659_vm4 = vcmp.eq.s32.totalorder %v625_v20, %v2122_v30 }
 0x177   :  { %1847 = vset.pattern.permute.xlu1 %v1938_v37  ;;  %860 = vperm.xlu2 %1848, %v1928_v9   ;;  %v1563_v54 = vsel %vm659_vm4, 1.0, %v1937_v34  ;;  %v522_v14 = vpop.permute.xlu2 %521  ;;  %vm1383_vm4 = vcmask 523264  }
 0x178   :  { %751 = vperm.xlu1 %1847, %v1927_v0   ;;  %v707_v57 = vadd.f32 %v1563_v54, %v595_v43  ;;  %vm550_vm14 = vcmp.eq.s32.totalorder %v522_v14, %v2122_v30 }
 0x179   :  { %v1550_v63 = vsel %vm550_vm14, 1.0, %v1937_v34 }
 0x17a   :  { %v598_v42 = vadd.f32 %v1550_v63, %v2543_v52 }
 0x17e   :  { %v740_v27 = vpop.permute.xlu1 %739 }
 0x17f   :  { %1852 = vset.pattern.permute.xlu2 %v1936_v32  ;;  %vm772_vm8 = vcmp.eq.s32.totalorder %v740_v27, %v2122_v30 }
 0x180   :  { %1851 = vset.pattern.permute.xlu1 %v1936_v32  ;;  %427 = vperm.xlu2 %1852, %v1930_v58   ;;  %v1579_v32 = vsel %vm771_vm7, 1.0, %v1937_v34  ;;  %v1580_v59 = vsel %vm772_vm8, 1.0, %v1937_v34  ;;  %v634_v9 = vpop.permute.xlu2 %633 }
 0x181   :  { %424 = vperm.xlu1 %1851, %v1931_v10   ;;  %v819_v0 = vadd.f32 %v1579_v32, %v707_v57  ;;  %v820_v19 = vadd.f32 %v1580_v59, %v708_v39  ;;  %vm662_vm15 = vcmp.eq.s32.totalorder %v634_v9, %v2122_v30 }
 0x182   :  { %v1566_v55 = vsel %vm662_vm15, 1.0, %v1937_v34 }
 0x183   :  { %v931_v3 = vadd.f32 %v1595_v15, %v819_v0  ;;  %v710_v50 = vadd.f32 %v1566_v55, %v598_v42  ;;  %v1738_v55 = vld [vmem:[%s2904_s1 + $0x28] sm:$0xff] }
 0x184   :  { %1126 = vmatmul.bf16.gmra.mxu0 %v1738_v55 }
 0x187   :  { %v852_v18 = vpop.permute.xlu1 %851 }
 0x188   :  { %vm884_vm10 = vcmp.eq.s32.totalorder %v852_v18, %v2122_v30  ;;  %1854 = vset.pattern.permute.xlu2 %v1935_v29 }
 0x189   :  { %v1596_v44 = vsel %vm884_vm10, 1.0, %v1937_v34  ;;  %1853 = vset.pattern.permute.xlu1 %v1935_v29  ;;  %539 = vperm.xlu2 %1854, %v1930_v58   ;;  %v855_v29 = vpop.permute.xlu2 %854 }
 0x18a   :  { %v932_v47 = vadd.f32 %v1596_v44, %v820_v19  ;;  %536 = vperm.xlu1 %1853, %v1931_v10   ;;  %v1102_v60 = vpop.f32.mrf.mxu0  ;;  %vm885_vm2 = vcmp.eq.s32.totalorder %v855_v29, %v2122_v30 }
 0x18b   :  { %v1597_v51 = vsel %vm885_vm2, 1.0, %v1937_v34 }
 0x18c   :  { %v944_v35 = vpack.c.bf16 %v932_v47, %v931_v3 }
 0x18e   :  { %1213 = vmatmul.bf16.gmra.mxu1 %v944_v35 }
 0x190   :  { %v519_v33 = vpop.permute.xlu1 %518 }
 0x191   :  { %1856 = vset.pattern.permute.xlu2 %v1938_v37  ;;  %vm549_vm12 = vcmp.eq.s32.totalorder %v519_v33, %v2122_v30 }
 0x192   :  { %1855 = vset.pattern.permute.xlu1 %v1939_v45  ;;  %760 = vperm.xlu2 %1856, %v1931_v10   ;;  %v1739_v45 = vld [vmem:[%s2904_s1 + $0x30] sm:$0xff]  ;;  %v2704_v7 = vpop.permute.xlu2 %418 }
 0x193   :  { %651 = vperm.xlu1 %1855, %v1930_v58   ;;  %1131 = vmatmul.bf16.vlgmr.msra.gmra.mxu3 %v1739_v45  ;;  %vm441_vm5 = vcmp.eq.s32.totalorder %v2704_v7, %v2122_v30 }
 0x194   :  { %1769 = vmatpush.bf16.msra.mxu3 %v1752_v13 }
 0x199   :  { %v631_v26 = vpop.permute.xlu1 %630 }
 0x19a   :  { %1858 = vset.pattern.permute.xlu2 %v1940_v53  ;;  %v1751_v53 = vld [vmem:[%s2906_s5 + $0x10] sm:$0xff]  ;;  %vm661_vm13 = vcmp.eq.s32.totalorder %v631_v26, %v2122_v30 }
 0x19b   :  { %1857 = vset.pattern.permute.xlu1 %v1938_v37  ;;  %872 = vperm.xlu2 %1858, %v1931_v10   ;;  %v1549_v37 = vsel %vm549_vm12, 1.0, %v1937_v34  ;;  %v1565_v38 = vsel %vm661_vm13, 1.0, %v1937_v34  ;;  %v534_v1 = vpop.permute.xlu2 %533 }
 0x19c   :  { %763 = vperm.xlu1 %1857, %v1930_v58   ;;  %1413 = vmatpush.bf16.msra.mxu2 %v1751_v53  ;;  %v597_v4 = vadd.f32 %v1549_v37, %v485_v36  ;;  %v1104_v58 = vpop.f32.mrf.mxu0  ;;  %v758_v36 = vpop.permute.xlu0 %757  ;;  %vm554_vm6 = vcmp.eq.s32.totalorder %v534_v1, %v2122_v30 }
 0x19d   :  { %1770 = vmatpush.bf16.msra.mxu3 %v1751_v53  ;;  %v1554_v63 = vsel %vm554_vm6, 1.0, %v1937_v34  ;;  %vm778_vm10 = vcmp.eq.s32.totalorder %v758_v36, %v2122_v30 }
 0x19e   :  { %v709_v23 = vadd.f32 %v1565_v38, %v597_v4  ;;  %v1537_v38 = vsel %vm441_vm5, 1.0, %v1937_v34 }
 0x1a0   :  { %1414 = vmatpush.bf16.msra.mxu2 %v1750_v49  ;;  %v821_v62 = vadd.f32 %v1581_v17, %v709_v23 }
 0x1a1   :  { %1771 = vmatpush.bf16.msra.mxu3 %v1750_v49 }
 0x1a2   :  { %v746_v21 = vpop.permute.xlu1 %745  ;;  %v933_v48 = vadd.f32 %v1597_v51, %v821_v62 }
 0x1a3   :  { %vm774_vm1 = vcmp.eq.s32.totalorder %v746_v21, %v2122_v30  ;;  %1136 = vmatmul.bf16.gmra.mxu3 %v1740_v5 }
 0x1a4   :  { %1415 = vmatpush.bf16.msra.mxu2 %v1749_v41  ;;  %v1582_v12 = vsel %vm774_vm1, 1.0, %v1937_v34  ;;  %v646_v14 = vpop.permute.xlu2 %645  ;;  %v1107_v9 = vpop.f32.mrf.mxu0 }
 0x1a5   :  { %v822_v54 = vadd.f32 %v1582_v12, %v710_v50  ;;  %1772 = vmatpush.bf16.msra.mxu3 %v1749_v41  ;;  %vm666_vm8 = vcmp.eq.s32.totalorder %v646_v14, %v2122_v30  ;;  %v489_v41 = vadd.f32 %v1537_v38, %v2383_v25  ;;  %v602_v12 = vadd.f32 %v1554_v63, %v2554_v28  ;;  %v864_v25 = vpop.permute.xlu0 %863 }
 0x1a6   :  { %v1570_v17 = vsel %vm666_vm8, 1.0, %v1937_v34  ;;  %vm888_vm5 = vcmp.eq.s32.totalorder %v864_v25, %v2122_v30 }
 0x1a7   :  { %v1199_v2 = vpop.f32.mrf.mxu1  ;;  %v1600_v36 = vsel %vm888_vm5, 1.0, %v1937_v34 }
 0x1a8   :  { %v1200_v20 = vadd.f32 %v1199_v2, %v1102_v60 }
 0x1aa   :  { %v1243_v40 = vadd.f32 %v2717_v11, %v1200_v20 }
 0x1ab   :  { %v858_v27 = vpop.permute.xlu1 %857 }
 0x1ac   :  { %v1259_v43 = vsub.f32 0.0, %v1243_v40  ;;  %vm886_vm3 = vcmp.eq.s32.totalorder %v858_v27, %v2122_v30  ;;  %v1109_v16 = vpop.f32.mrf.mxu0  ;;  %v714_v40 = vadd.f32 %v1570_v17, %v602_v12  ;;  %v1586_v27 = vsel %vm778_vm10, 1.0, %v1937_v34 }
 0x1ad   :  { %v1598_v52 = vsel %vm886_vm3, 1.0, %v1937_v34  ;;  %v755_v3 = vpop.permute.xlu2 %754 }
 0x1ae   :  { %v934_v10 = vadd.f32 %v1598_v52, %v822_v54  ;;  %v1275_v57 = vmul.f32 1.442695, %v1259_v43  ;;  %vm777_vm11 = vcmp.eq.s32.totalorder %v755_v3, %v2122_v30  ;;  %v826_v52 = vadd.f32 %v1586_v27, %v714_v40 }
 0x1af   :  { %v1201_v6 = vpop.f32.mrf.mxu1  ;;  %v1585_v1 = vsel %vm777_vm11, 1.0, %v1937_v34 }
 0x1b0   :  { %v1202_v32 = vadd.f32 %v1201_v6, %v1104_v58  ;;  %v945_v31 = vpack.c.bf16 %v934_v10, %v933_v48  ;;  %1862 = vpow2.f32 %v1275_v57 }
 0x1b2   :  { %v1244_v59 = vadd.f32 %v2717_v11, %v1202_v32  ;;  %1218 = vmatmul.bf16.gmra.mxu1 %v945_v31 }
 0x1b4   :  { %v1260_v39 = vsub.f32 0.0, %v1244_v59  ;;  %v531_v0 = vpop.permute.xlu1 %530 }
 0x1b5   :  { %vm553_vm7 = vcmp.eq.s32.totalorder %v531_v0, %v2122_v30 }
 0x1b6   :  { %v1277_v15 = vmul.f32 1.442695, %v1260_v39  ;;  %v1863_v18 = vpop.eup %1862  ;;  %v2737_v45 = vpop.permute.xlu2 %527  ;;  %v1553_v7 = vsel %vm553_vm7, 1.0, %v1937_v34 }
 0x1b7   :  { %v1307_v19 = vadd.f32 1.0, %v1863_v18  ;;  %v601_v50 = vadd.f32 %v1553_v7, %v489_v41  ;;  %v637_v39 = vpop.permute.xlu0 %636  ;;  %vm552_vm1 = vcmp.eq.s32.totalorder %v2737_v45, %v2122_v30 }
 0x1b8   :  { %1864 = vpow2.f32 %v1277_v15  ;;  %vm663_vm0 = vcmp.eq.s32.totalorder %v637_v39, %v2122_v30 }
 0x1b9   :  { %1866 = vrcp.f32 %v1307_v19  ;;  %v1112_v19 = vpop.f32.mrf.mxu0 }
 0x1bd   :  { %v643_v44 = vpop.permute.xlu1 %642 }
 0x1be   :  { %v1865_v47 = vpop.eup %1864  ;;  %vm665_vm9 = vcmp.eq.s32.totalorder %v643_v44, %v2122_v30 }
 0x1bf   :  { %v1308_v35 = vadd.f32 1.0, %v1865_v47  ;;  %v1867_v61 = vpop.eup %1866  ;;  %v1569_v2 = vsel %vm665_vm9, 1.0, %v1937_v34  ;;  %v870_v42 = vpop.permute.xlu2 %869  ;;  %v1567_v47 = vsel %vm663_vm0, 1.0, %v1937_v34 }
 0x1c0   :  { %v713_v51 = vadd.f32 %v1569_v2, %v601_v50  ;;  %vm890_vm12 = vcmp.eq.s32.totalorder %v870_v42, %v2122_v30 }
 0x1c1   :  { %1868 = vrcp.f32 %v1308_v35  ;;  %v1602_v28 = vsel %vm890_vm12, 1.0, %v1937_v34 }
 0x1c2   :  { %v825_v58 = vadd.f32 %v1585_v1, %v713_v51  ;;  %v938_v57 = vadd.f32 %v1602_v28, %v826_v52 }
 0x1c5   :  { %v1204_v33 = vpop.f32.mrf.mxu1 }
 0x1c6   :  { %v1205_v29 = vadd.f32 %v1204_v33, %v1107_v9  ;;  %v2735_v26 = vpop.permute.xlu1 %415  ;;  %v1552_v33 = vsel %vm552_vm1, 1.0, %v1937_v34 }
 0x1c7   :  { %v1869_v13 = vpop.eup %1868  ;;  %vm440_vm15 = vcmp.eq.s32.totalorder %v2735_v26, %v2122_v30 }
 0x1c8   :  { %v1245_v53 = vadd.f32 %v2717_v11, %v1205_v29  ;;  %v1339_v22 = vpack.c.bf16 %v1869_v13, %v1867_v61  ;;  %v749_v10 = vpop.permute.xlu2 %748  ;;  %v1536_v15 = vsel %vm440_vm15, 1.0, %v1937_v34 }
 0x1c9   :  { %v488_v9 = vadd.f32 %v1536_v15, %v2339_v24  ;;  %vm775_vm2 = vcmp.eq.s32.totalorder %v749_v10, %v2122_v30 }
 0x1ca   :  { %v1261_v37 = vsub.f32 0.0, %v1245_v53  ;;  %1717 = vmatmul.msk.bf16.vlgmr.msra.gmra.mxu2 %vm1383_vm4, %v1339_v22  ;;  %v1583_v13 = vsel %vm775_vm2, 1.0, %v1937_v34 }
 0x1cb   :  { %v600_v24 = vadd.f32 %v1552_v33, %v488_v9 }
 0x1cc   :  { %v1279_v21 = vmul.f32 1.442695, %v1261_v37 }
 0x1cd   :  { %v1206_v49 = vpop.f32.mrf.mxu1 }
 0x1ce   :  { %v1207_v60 = vadd.f32 %v1206_v49, %v1109_v16  ;;  %1870 = vpow2.f32 %v1279_v21 }
 0x1cf   :  { %v525_v4 = vpop.permute.xlu1 %524 }
 0x1d0   :  { %v1246_v23 = vadd.f32 %v2717_v11, %v1207_v60  ;;  %vm551_vm14 = vcmp.eq.s32.totalorder %v525_v4, %v2122_v30  ;;  %v1114_v4 = vpop.f32.mrf.mxu0 }
 0x1d1   :  { %v1551_v0 = vsel %vm551_vm14, 1.0, %v1937_v34  ;;  %v861_v3 = vpop.permute.xlu2 %860 }
 0x1d2   :  { %v1262_v20 = vsub.f32 0.0, %v1246_v23  ;;  %v599_v18 = vadd.f32 %v1551_v0, %v2571_v8  ;;  %vm887_vm6 = vcmp.eq.s32.totalorder %v861_v3, %v2122_v30 }
 0x1d3   :  { %v1599_v21 = vsel %vm887_vm6, 1.0, %v1937_v34 }
 0x1d4   :  { %v1281_v62 = vmul.f32 1.442695, %v1262_v20  ;;  %v1871_v54 = vpop.eup %1870  ;;  %v711_v29 = vadd.f32 %v1567_v47, %v599_v18 }
 0x1d5   :  { %v1309_v5 = vadd.f32 1.0, %v1871_v54 }
 0x1d6   :  { %1872 = vpow2.f32 %v1281_v62  ;;  %v823_v37 = vadd.f32 %v1583_v13, %v711_v29 }
 0x1d7   :  { %1874 = vrcp.f32 %v1309_v5 }
 0x1d8   :  { %v867_v43 = vpop.permute.xlu1 %866  ;;  %v935_v7 = vadd.f32 %v1599_v21, %v823_v37 }
 0x1d9   :  { %vm889_vm13 = vcmp.eq.s32.totalorder %v867_v43, %v2122_v30  ;;  %v649_v43 = vpop.permute.xlu0 %648 }
 0x1da   :  { %v1601_v48 = vsel %vm889_vm13, 1.0, %v1937_v34  ;;  %v428_v63 = vpop.permute.xlu2 %427  ;;  %vm667_vm11 = vcmp.eq.s32.totalorder %v649_v43, %v2122_v30 }
 0x1db   :  { %v937_v6 = vadd.f32 %v1601_v48, %v825_v58  ;;  %vm444_vm10 = vcmp.eq.s32.totalorder %v428_v63, %v2122_v30 }
 0x1dc   :  { %v1873_v32 = vpop.eup %1872 }
 0x1dd   :  { %v1310_v31 = vadd.f32 1.0, %v1873_v32  ;;  %v947_v59 = vpack.c.bf16 %v938_v57, %v937_v6  ;;  %v1875_v44 = vpop.eup %1874  ;;  %v1117_v6 = vpop.f32.mrf.mxu0  ;;  %v1540_v32 = vsel %vm444_vm10, 1.0, %v1937_v34 }
 0x1df   :  { %1876 = vrcp.f32 %v1310_v31  ;;  %1228 = vmatmul.bf16.vlgmr.msrb.gmra.mxu3 %v947_v59  ;;  %v1571_v31 = vsel %vm667_vm11, 1.0, %v1937_v34 }
 0x1e1   :  { %v640_v14 = vpop.permute.xlu1 %639  ;;  %v876_v0 = vpop.permute.xlu0 %875 }
 0x1e2   :  { %vm664_vm3 = vcmp.eq.s32.totalorder %v640_v14, %v2122_v30  ;;  %v492_v14 = vadd.f32 %v1540_v32, %v2417_v56  ;;  %vm892_vm0 = vcmp.eq.s32.totalorder %v876_v0, %v2122_v30 }
 0x1e3   :  { %v1568_v8 = vsel %vm664_vm3, 1.0, %v1937_v34  ;;  %v540_v25 = vpop.permute.xlu2 %539  ;;  %v1604_v13 = vsel %vm892_vm0, 1.0, %v1937_v34 }
 0x1e4   :  { %v712_v16 = vadd.f32 %v1568_v8, %v600_v24  ;;  %vm556_vm12 = vcmp.eq.s32.totalorder %v540_v25, %v2122_v30 }
 0x1e5   :  { %v1877_v35 = vpop.eup %1876 }
 0x1e6   :  { %v1340_v61 = vpack.c.bf16 %v1877_v35, %v1875_v44 }
 0x1e7   :  { %v1209_v26 = vpop.f32.mrf.mxu1 }
 0x1e8   :  { %v1210_v45 = vadd.f32 %v1209_v26, %v1112_v19  ;;  %1718 = vmatmul.msk.bf16.gmra.mxu2 %vm1383_vm4, %v1340_v61 }
 0x1ea   :  { %v1247_v53 = vadd.f32 %v2717_v11, %v1210_v45  ;;  %v752_v22 = vpop.permute.xlu1 %751  ;;  %v1119_v45 = vpop.f32.mrf.mxu0 }
 0x1eb   :  { %vm776_vm7 = vcmp.eq.s32.totalorder %v752_v22, %v2122_v30 }
 0x1ec   :  { %v1263_v49 = vsub.f32 0.0, %v1247_v53  ;;  %v1584_v38 = vsel %vm776_vm7, 1.0, %v1937_v34  ;;  %v761_v54 = vpop.permute.xlu2 %760 }
 0x1ed   :  { %v824_v60 = vadd.f32 %v1584_v38, %v712_v16  ;;  %vm779_vm13 = vcmp.eq.s32.totalorder %v761_v54, %v2122_v30 }
 0x1ee   :  { %v1283_v23 = vmul.f32 1.442695, %v1263_v49  ;;  %v1587_v19 = vsel %vm779_vm13, 1.0, %v1937_v34 }
 0x1ef   :  { %v1211_v41 = vpop.f32.mrf.mxu1  ;;  %v936_v55 = vadd.f32 %v1600_v36, %v824_v60 }
 0x1f0   :  { %v1212_v17 = vadd.f32 %v1211_v41, %v1114_v4  ;;  %1878 = vpow2.f32 %v1283_v23 }
 0x1f1   :  { %v946_v2 = vpack.c.bf16 %v936_v55, %v935_v7 }
 0x1f2   :  { %v1248_v42 = vadd.f32 %v2717_v11, %v1212_v17  ;;  %v1122_v23 = vpop.f32.mrf.mxu0 }
 0x1f3   :  { %v425_v20 = vpop.permute.xlu1 %424  ;;  %1223 = vmatmul.bf16.gmra.mxu1 %v946_v2 }
 0x1f4   :  { %v1264_v12 = vsub.f32 0.0, %v1248_v42  ;;  %vm443_vm8 = vcmp.eq.s32.totalorder %v425_v20, %v2122_v30 }
 0x1f5   :  { %v1539_v28 = vsel %vm443_vm8, 1.0, %v1937_v34  ;;  %v873_v39 = vpop.permute.xlu2 %872 }
 0x1f6   :  { %v1285_v50 = vmul.f32 1.442695, %v1264_v12  ;;  %v1879_v62 = vpop.eup %1878  ;;  %v491_v58 = vadd.f32 %v1539_v28, %v2364_v46  ;;  %v1556_v46 = vsel %vm556_vm12, 1.0, %v1937_v34  ;;  %vm891_vm15 = vcmp.eq.s32.totalorder %v873_v39, %v2122_v30 }
 0x1f7   :  { %v1311_v40 = vadd.f32 1.0, %v1879_v62  ;;  %v604_v3 = vadd.f32 %v1556_v46, %v492_v14  ;;  %v1603_v56 = vsel %vm891_vm15, 1.0, %v1937_v34 }
 0x1f8   :  { %1880 = vpow2.f32 %v1285_v50 }
 0x1f9   :  { %1882 = vrcp.f32 %v1311_v40 }
 0x1fa   :  { %v1124_v20 = vpop.f32.mrf.mxu0 }
 0x1fc   :  { %v537_v51 = vpop.permute.xlu1 %536 }
 0x1fd   :  { %vm555_vm9 = vcmp.eq.s32.totalorder %v537_v51, %v2122_v30 }
 0x1fe   :  { %v1881_v27 = vpop.eup %1880  ;;  %v1555_v52 = vsel %vm555_vm9, 1.0, %v1937_v34 }
 0x1ff   :  { %v1312_v1 = vadd.f32 1.0, %v1881_v27  ;;  %v1883_v10 = vpop.eup %1882  ;;  %v603_v57 = vadd.f32 %v1555_v52, %v491_v58  ;;  %v2822_v52 = vld [vmem:[%s2907_s6] ss:$0 sm:$0xff] }
 0x201   :  { %1884 = vrcp.f32 %v1312_v1  ;;  %v715_v15 = vadd.f32 %v1571_v31, %v603_v57 }
 0x202   :  { %v1127_v14 = vpop.f32.mrf.mxu0 }
 0x203   :  { %v827_v33 = vadd.f32 %v1587_v19, %v715_v15 }
 0x205   :  { %v652_v5 = vpop.permute.xlu1 %651  ;;  %v939_v24 = vadd.f32 %v1603_v56, %v827_v33 }
 0x206   :  { %vm668_vm14 = vcmp.eq.s32.totalorder %v652_v5, %v2122_v30 }
 0x207   :  { %v1885_v48 = vpop.eup %1884  ;;  %v1572_v44 = vsel %vm668_vm14, 1.0, %v1937_v34 }
 0x208   :  { %v1341_v59 = vpack.c.bf16 %v1885_v48, %v1883_v10  ;;  %v716_v61 = vadd.f32 %v1572_v44, %v604_v3 }
 0x20a   :  { %1719 = vmatmul.msk.bf16.gmra.mxu2 %vm1383_vm4, %v1341_v59 }
 0x20b   :  { %v1214_v18 = vpop.f32.mrf.mxu1 }
 0x20c   :  { %v1215_v47 = vadd.f32 %v1214_v18, %v1117_v6 }
 0x20e   :  { %v1249_v35 = vadd.f32 %v2717_v11, %v1215_v47  ;;  %v764_v9 = vpop.permute.xlu1 %763 }
 0x20f   :  { %vm780_vm1 = vcmp.eq.s32.totalorder %v764_v9, %v2122_v30  ;;  %v1129_v9 = vpop.f32.mrf.mxu0 }
 0x210   :  { %v1265_v29 = vsub.f32 0.0, %v1249_v35  ;;  %v1588_v26 = vsel %vm780_vm1, 1.0, %v1937_v34 }
 0x211   :  { %v828_v8 = vadd.f32 %v1588_v26, %v716_v61 }
 0x212   :  { %v1287_v53 = vmul.f32 1.442695, %v1265_v29 }
 0x213   :  { %v940_v22 = vadd.f32 %v1604_v13, %v828_v8  ;;  %v1216_v37 = vpop.f32.mrf.mxu1 }
 0x214   :  { %v1217_v16 = vadd.f32 %v1216_v37, %v1119_v45  ;;  %1886 = vpow2.f32 %v1287_v53 }
 0x215   :  { %v948_v36 = vpack.c.bf16 %v940_v22, %v939_v24 }
 0x216   :  { %v1250_v21 = vadd.f32 %v2717_v11, %v1217_v16  ;;  %v1132_v28 = vpop.f32.mrf.mxu3 }
 0x217   :  { %1233 = vmatmul.bf16.gmra.mxu3 %v948_v36 }
 0x218   :  { %v1266_v30 = vsub.f32 0.0, %v1250_v21 }
 0x21a   :  { %v1289_v49 = vmul.f32 1.442695, %v1266_v30  ;;  %v1887_v38 = vpop.eup %1886 }
 0x21b   :  { %v1313_v60 = vadd.f32 1.0, %v1887_v38 }
 0x21c   :  { %1888 = vpow2.f32 %v1289_v49 }
 0x21d   :  { %1890 = vrcp.f32 %v1313_v60 }
 0x21e   :  { %v1134_v57 = vpop.f32.mrf.mxu3 }
 0x222   :  { %v1889_v4 = vpop.eup %1888 }
 0x223   :  { %v1314_v63 = vadd.f32 1.0, %v1889_v4  ;;  %v1891_v34 = vpop.eup %1890 }
 0x225   :  { %1892 = vrcp.f32 %v1314_v63 }
 0x226   :  { %v1137_v59 = vpop.f32.mrf.mxu3 }
 0x22b   :  { %v1893_v7 = vpop.eup %1892 }
 0x22c   :  { %v1342_v41 = vpack.c.bf16 %v1893_v7, %v1891_v34 }
 0x22e   :  { %1720 = vmatmul.msk.bf16.gmra.mxu2 %vm1383_vm4, %v1342_v41  ;;  %v2833_v46 = vpop.f32.mrf.mxu3 }
 0x22f   :  { %v1219_v55 = vpop.f32.mrf.mxu1 }
 0x230   :  { %v1220_v17 = vadd.f32 %v1219_v55, %v1122_v23 }
 0x232   :  { %v1251_v2 = vadd.f32 %v2717_v11, %v1220_v17 }
 0x234   :  { %v1267_v42 = vsub.f32 0.0, %v1251_v2 }
 0x236   :  { %v1291_v12 = vmul.f32 1.442695, %v1267_v42 }
 0x237   :  { %v1221_v50 = vpop.f32.mrf.mxu1 }
 0x238   :  { %v1222_v25 = vadd.f32 %v1221_v50, %v1124_v20  ;;  %1894 = vpow2.f32 %v1291_v12 }
 0x23a   :  { %v1252_v62 = vadd.f32 %v2717_v11, %v1222_v25 }
 0x23c   :  { %v1268_v40 = vsub.f32 0.0, %v1252_v62 }
 0x23e   :  { %v1293_v51 = vmul.f32 1.442695, %v1268_v40  ;;  %v1895_v27 = vpop.eup %1894 }
 0x23f   :  { %v1315_v1 = vadd.f32 1.0, %v1895_v27 }
 0x240   :  { %1896 = vpow2.f32 %v1293_v51 }
 0x241   :  { %1898 = vrcp.f32 %v1315_v1 }
 0x246   :  { %v1897_v54 = vpop.eup %1896 }
 0x247   :  { %v1316_v43 = vadd.f32 1.0, %v1897_v54  ;;  %v1899_v5 = vpop.eup %1898 }
 0x249   :  { %1900 = vrcp.f32 %v1316_v43 }
 0x24d   :  { %v1417_v58 = vpop.f32.mrf.mxu2 }
 0x24e   :  { %v1418_v10 = vadd.f32 %v2822_v52, %v1417_v58 }
 0x24f   :  { %v1901_v48 = vpop.eup %1900 }
 0x250   :  { %1457 = vst [vmem:[%s2908_s7] sm:$0xff] %v1418_v10  ;;  %v1343_v6 = vpack.c.bf16 %v1901_v48, %v1899_v5 }
 0x252   :  { %1721 = vmatmul.msk.bf16.gmra.mxu2 %vm1383_vm4, %v1343_v6 }
 0x255   :  { %v1419_v32 = vpop.f32.mrf.mxu2 }
 0x256   :  { %v1420_v31 = vadd.f32 %v2822_v52, %v1419_v32 }
 0x258   :  { %1458 = vst [vmem:[%s2908_s7 + $0x8] sm:$0xff] %v1420_v31 }
 0x262   :  { %v1229_v15 = vpop.f32.mrf.mxu3 }
 0x263   :  { %v1230_v8 = vadd.f32 %v1229_v15, %v1132_v28 }
 0x265   :  { %v1255_v22 = vadd.f32 %v2717_v11, %v1230_v8 }
 0x267   :  { %v1271_v36 = vsub.f32 0.0, %v1255_v22 }
 0x269   :  { %v1299_v60 = vmul.f32 1.442695, %v1271_v36 }
 0x26a   :  { %v1231_v33 = vpop.f32.mrf.mxu3 }
 0x26b   :  { %v1422_v39 = vpop.f32.mrf.mxu2  ;;  %v1232_v26 = vadd.f32 %v1231_v33, %v1134_v57 }
 0x26c   :  { %v1423_v0 = vadd.f32 %v2822_v52, %v1422_v39 }
 0x26d   :  { %v1256_v24 = vadd.f32 %v2717_v11, %v1232_v26 }
 0x26e   :  { %1459 = vst [vmem:[%s2908_s7 + $0x10] sm:$0xff] %v1423_v0 }
 0x26f   :  { %v1272_v16 = vsub.f32 0.0, %v1256_v24 }
 0x270   :  { %v1224_v18 = vpop.f32.mrf.mxu1 }
 0x271   :  { %v1225_v19 = vadd.f32 %v1224_v18, %v1127_v14  ;;  %v1301_v49 = vmul.f32 1.442695, %v1272_v16 }
 0x273   :  { %v1253_v44 = vadd.f32 %v2717_v11, %v1225_v19  ;;  %v1424_v47 = vpop.f32.mrf.mxu2 }
 0x274   :  { %v1425_v3 = vadd.f32 %v2822_v52, %v1424_v47 }
 0x275   :  { %v1269_v35 = vsub.f32 0.0, %v1253_v44 }
 0x276   :  { %1460 = vst [vmem:[%s2908_s7 + $0x18] sm:$0xff] %v1425_v3 }
 0x277   :  { %v1295_v61 = vmul.f32 1.442695, %v1269_v35 }
 0x278   :  { %v1226_v56 = vpop.f32.mrf.mxu1 }
 0x279   :  { %v1227_v29 = vadd.f32 %v1226_v56, %v1129_v9  ;;  %1902 = vpow2.f32 %v1295_v61 }
 0x27b   :  { %v1254_v13 = vadd.f32 %v2717_v11, %v1227_v29 }
 0x27d   :  { %v1270_v45 = vsub.f32 0.0, %v1254_v13 }
 0x27f   :  { %v1297_v53 = vmul.f32 1.442695, %v1270_v45  ;;  %v1903_v37 = vpop.eup %1902 }
 0x280   :  { %v1317_v21 = vadd.f32 1.0, %v1903_v37 }
 0x281   :  { %1904 = vpow2.f32 %v1297_v53 }
 0x282   :  { %1906 = vrcp.f32 %v1317_v21 }
 0x287   :  { %v1905_v30 = vpop.eup %1904 }
 0x288   :  { %v1318_v38 = vadd.f32 1.0, %v1905_v30  ;;  %v1907_v34 = vpop.eup %1906 }
 0x28a   :  { %1908 = vrcp.f32 %v1318_v38 }
 0x28b   :  { %1910 = vpow2.f32 %v1301_v49 }
 0x28c   :  { %1912 = vpow2.f32 %v1299_v60 }
 0x28d   :  { %v1427_v4 = vpop.f32.mrf.mxu2 }
 0x28e   :  { %v1428_v63 = vadd.f32 %v2822_v52, %v1427_v4 }
 0x290   :  { %v1909_v7 = vpop.eup %1908  ;;  %1461 = vst [vmem:[%s2908_s7 + $0x20] sm:$0xff] %v1428_v63 }
 0x291   :  { %v1911_v23 = vpop.eup %1910  ;;  %v1344_v41 = vpack.c.bf16 %v1909_v7, %v1907_v34 }
 0x292   :  { %v1913_v55 = vpop.eup %1912  ;;  %v1320_v17 = vadd.f32 1.0, %v1911_v23 }
 0x293   :  { %1722 = vmatmul.msk.bf16.gmra.mxu2 %vm1383_vm4, %v1344_v41  ;;  %v1319_v42 = vadd.f32 1.0, %v1913_v55 }
 0x294   :  { %1914 = vrcp.f32 %v1320_v17 }
 0x295   :  { %v1429_v2 = vpop.f32.mrf.mxu2  ;;  %1916 = vrcp.f32 %v1319_v42 }
 0x296   :  { %v1430_v20 = vadd.f32 %v2822_v52, %v1429_v2 }
 0x298   :  { %1462 = vst [vmem:[%s2908_s7 + $0x28] sm:$0xff] %v1430_v20 }
 0x29a   :  { %v1234_v12 = vpop.f32.mrf.mxu3  ;;  %v1915_v62 = vpop.eup %1914 }
 0x29b   :  { %v1235_v50 = vadd.f32 %v1234_v12, %v1137_v59  ;;  %v1917_v51 = vpop.eup %1916 }
 0x29c   :  { %v1345_v27 = vpack.c.bf16 %v1915_v62, %v1917_v51 }
 0x29d   :  { %v1257_v25 = vadd.f32 %v2717_v11, %v1235_v50 }
 0x29f   :  { %v1273_v40 = vsub.f32 0.0, %v1257_v25 }
 0x2a1   :  { %v1303_v1 = vmul.f32 1.442695, %v1273_v40 }
 0x2a2   :  { %v1236_v54 = vpop.f32.mrf.mxu3 }
 0x2a3   :  { %v1237_v28 = vadd.f32 %v1236_v54, %v2833_v46  ;;  %1723 = vmatmul.msk.bf16.gmra.mxu2 %vm1383_vm4, %v1345_v27  ;;  %1918 = vpow2.f32 %v1303_v1 }
 0x2a5   :  { %v1258_v43 = vadd.f32 %v2717_v11, %v1237_v28 }
 0x2a7   :  { %v1274_v58 = vsub.f32 0.0, %v1258_v43 }
 0x2a9   :  { %v1305_v5 = vmul.f32 1.442695, %v1274_v58  ;;  %v1919_v10 = vpop.eup %1918 }
 0x2aa   :  { %v1321_v48 = vadd.f32 1.0, %v1919_v10 }
 0x2ab   :  { %1920 = vpow2.f32 %v1305_v5 }
 0x2ac   :  { %1922 = vrcp.f32 %v1321_v48 }
 0x2b1   :  { %v1921_v57 = vpop.eup %1920  ;;  %v1432_v6 = vpop.f32.mrf.mxu2 }
 0x2b2   :  { %v1322_v32 = vadd.f32 1.0, %v1921_v57  ;;  %v1433_v31 = vadd.f32 %v2822_v52, %v1432_v6  ;;  %v1923_v59 = vpop.eup %1922 }
 0x2b4   :  { %1924 = vrcp.f32 %v1322_v32  ;;  %1463 = vst [vmem:[%s2908_s7 + $0x30] sm:$0xff] %v1433_v31 }
 0x2b9   :  { %v1434_v46 = vpop.f32.mrf.mxu2 }
 0x2ba   :  { %v1925_v11 = vpop.eup %1924  ;;  %v1435_v39 = vadd.f32 %v2822_v52, %v1434_v46 }
 0x2bb   :  { %v1346_v0 = vpack.c.bf16 %v1925_v11, %v1923_v59 }
 0x2bc   :  { %1464 = vst [vmem:[%s2908_s7 + $0x38] sm:$0xff] %v1435_v39 }
 0x2bd   :  { %1724 = vmatmul.msk.bf16.vlgmr.msra.gmra.mxu3 %vm1383_vm4, %v1346_v0 }
 0x2d5   :  { %v1437_v14 = vpop.f32.mrf.mxu2 }
 0x2d6   :  { %v1438_v15 = vadd.f32 %v2822_v52, %v1437_v14 }
 0x2d8   :  { %1465 = vst [vmem:[%s2908_s7 + $0x40] sm:$0xff] %v1438_v15 }
 0x2dd   :  { %v1439_v18 = vpop.f32.mrf.mxu2 }
 0x2de   :  { %v1440_v19 = vadd.f32 %v2822_v52, %v1439_v18 }
 0x2e0   :  { %1466 = vst [vmem:[%s2908_s7 + $0x48] sm:$0xff] %v1440_v19 }
 0x316   :  { %v1442_v44 = vpop.f32.mrf.mxu2 }
 0x317   :  { %v1443_v47 = vadd.f32 %v2822_v52, %v1442_v44 }
 0x319   :  { %1467 = vst [vmem:[%s2908_s7 + $0x50] sm:$0xff] %v1443_v47 }
 0x31e   :  { %v1444_v3 = vpop.f32.mrf.mxu2 }
 0x31f   :  { %v1445_v35 = vadd.f32 %v2822_v52, %v1444_v3 }
 0x321   :  { %1468 = vst [vmem:[%s2908_s7 + $0x58] sm:$0xff] %v1445_v35 }
 0x326   :  { %v1447_v9 = vpop.f32.mrf.mxu2 }
 0x327   :  { %v1448_v33 = vadd.f32 %v2822_v52, %v1447_v9 }
 0x329   :  { %1469 = vst [vmem:[%s2908_s7 + $0x60] sm:$0xff] %v1448_v33 }
 0x32e   :  { %v1449_v61 = vpop.f32.mrf.mxu2 }
 0x32f   :  { %v1450_v56 = vadd.f32 %v2822_v52, %v1449_v61 }
 0x331   :  { %1470 = vst [vmem:[%s2908_s7 + $0x68] sm:$0xff] %v1450_v56 }
 0x340   :  { %v1452_v29 = vpop.f32.mrf.mxu3 }
 0x341   :  { %v1453_v26 = vadd.f32 %v2822_v52, %v1452_v29 }
 0x343   :  { %1471 = vst [vmem:[%s2908_s7 + $0x70] sm:$0xff] %v1453_v26 }
 0x348   :  { %v1454_v13 = vpop.f32.mrf.mxu3 }
 0x349   :  { %v1455_v8 = vadd.f32 %v2822_v52, %v1454_v13 }
 0x34b   :  { %1472 = vst [vmem:[%s2908_s7 + $0x78] sm:$0xff] %v1455_v8 }

</bundles_post_ra>
